<compile_context>
chip_gen: v7x
topology: tpu7x:2x2x1
jax: 0.10.0
libtpu: 0.0.40
codegen_flags: <defaults>
</compile_context>

<pallas_src>
import math
import jax
import jax.numpy as jnp
from jax.experimental import pallas as pl
from jax.experimental.pallas import tpu as pltpu

_VMEM_LIMIT = 48 * 1024 * 1024   # leave headroom on v7x (64 MiB physical); 128 MiB on v5e/v6e


def _round_up(x, m):
    return (x + m - 1) // m * m


def _gelu(y, approximate):
    if approximate:
        # tanh-GELU: bulk of the work moves to the otherwise-idle EUP slot (prefer on v5e).
        c = math.sqrt(2.0 / math.pi)
        return 0.5 * y * (1.0 + jnp.tanh(c * (y + 0.044715 * y * y * y)))
    # exact erf-GELU for parity with PyTorch nn.GELU()
    return 0.5 * y * (1.0 + jax.lax.erf(y * (1.0 / math.sqrt(2.0))))


# ---------------------------- kernel 1: proj_1 + GELU (lane-dense MXU) ----------------------------

def _make_head_kernel(approximate_gelu):
    def kernel(x_ref, w1_ref, b1_ref, u_ref):
        y = jnp.dot(w1_ref[...], x_ref[0].astype(jnp.float32),
                    preferred_element_type=jnp.float32) + b1_ref[...]
        u_ref[0] = _gelu(y, approximate_gelu).astype(u_ref.dtype)
    return kernel


def _head_call(x3, w1, b1, tl, approximate_gelu):
    N, C, L = x3.shape
    act_spec = pl.BlockSpec((1, C, tl), lambda n, t: (n, 0, t))
    return pl.pallas_call(
        _make_head_kernel(approximate_gelu),
        out_shape=jax.ShapeDtypeStruct((N, C, L), x3.dtype),
        grid=(N, L // tl),
        in_specs=[act_spec,
                  pl.BlockSpec((C, C), lambda n, t: (0, 0)),
                  # constant index map -> fetched once, stays VMEM-resident
                  pl.BlockSpec((C, 1), lambda n, t: (0, 0))],
        out_specs=act_spec,
        compiler_params=pltpu.CompilerParams(
            dimension_semantics=("parallel", "parallel"),
            vmem_limit_bytes=_VMEM_LIMIT),
    )(x3, w1, b1.reshape(C, 1))


# ---------------------------- kernel 2: fused depthwise 5^3 -> 11^3 ----------------------------

def _make_depthwise_kernel(D, HW, K1, K2):
    P1, P2 = K1 // 2, K2 // 2

    def kernel(u_ref, b5_ref, b11_ref, B5_ref, B11_ref, attn_ref, pad5_ref, pad11_ref):
        c = pl.program_id(0)
        h = u_ref[0, 0].astype(jnp.float32)                       # (D, HW)

        # ---- conv0: depthwise 5x5x5, 'same'.  H/W padding lives inside the band
        # matrices; only the D halo rows are zeroed (interior fully overwritten,
        # zeroed every step so correctness is independent of megacore sharding).
        pad5_ref[pl.ds(0, P1), :] = jnp.zeros((P1, HW), jnp.float32)
        pad5_ref[pl.ds(P1 + D, P1), :] = jnp.zeros((P1, HW), jnp.float32)
        pad5_ref[pl.ds(P1, D), :] = h
        mid = jnp.full((D, HW), b5_ref[c], dtype=jnp.float32)
        for kd in range(K1):                                       # 5 fat MXU matmuls
            mid = mid + jnp.dot(pad5_ref[pl.ds(kd, D), :], B5_ref[0, kd],
                                preferred_element_type=jnp.float32)

        # ---- conv_spatial: depthwise 11x11x11, 'same' ----
        pad11_ref[pl.ds(0, P2), :] = jnp.zeros((P2, HW), jnp.float32)
        pad11_ref[pl.ds(P2 + D, P2), :] = jnp.zeros((P2, HW), jnp.float32)
        pad11_ref[pl.ds(P2, D), :] = mid
        attn = jnp.full((D, HW), b11_ref[c], dtype=jnp.float32)
        for kd in range(K2):                                       # 11 fat MXU matmuls
            attn = attn + jnp.dot(pad11_ref[pl.ds(kd, D), :], B11_ref[0, kd],
                                  preferred_element_type=jnp.float32)

        attn_ref[0, 0] = attn.astype(attn_ref.dtype)

    return kernel


def _depthwise_call(u4, B5, B11, b5, b11):
    # u4: (N, C, D, HW) -- flattened H*W on the lane axis
    N, C, D, HW = u4.shape
    K1, K2 = B5.shape[1], B11.shape[1]
    P1, P2 = K1 // 2, K2 // 2
    return pl.pallas_call(
        _make_depthwise_kernel(D, HW, K1, K2),
        out_shape=jax.ShapeDtypeStruct((N, C, D, HW), u4.dtype),
        # channel-major grid: band weights (indexed only by c) are fetched once per
        # channel and stay VMEM-resident across the inner batch axis.
        grid=(C, N),
        in_specs=[
            pl.BlockSpec((1, 1, D, HW), lambda c, n: (n, c, 0, 0)),     # u (single channel)
            pl.BlockSpec(memory_space=pltpu.MemorySpace.SMEM),          # b5  (C,)
            pl.BlockSpec(memory_space=pltpu.MemorySpace.SMEM),          # b11 (C,)
            pl.BlockSpec((1, K1, HW, HW), lambda c, n: (c, 0, 0, 0)),   # B5  (resident over n)
            pl.BlockSpec((1, K2, HW, HW), lambda c, n: (c, 0, 0, 0)),   # B11 (resident over n)
        ],
        out_specs=pl.BlockSpec((1, 1, D, HW), lambda c, n: (n, c, 0, 0)),
        scratch_shapes=[
            # D-padded planes; sublane count rounded up to a multiple of 8
            pltpu.VMEM((_round_up(D + 2 * P1, 8), HW), jnp.float32),
            pltpu.VMEM((_round_up(D + 2 * P2, 8), HW), jnp.float32),
        ],
        compiler_params=pltpu.CompilerParams(
            dimension_semantics=("parallel", "arbitrary"),
            vmem_limit_bytes=_VMEM_LIMIT),
    )(u4, b5, b11, B5, B11)


# ---------------------------- kernel 3: conv1 * u, proj_2, + shortcut (fused) ----------------------------

def _tail_kernel(attn_ref, u_ref, s_ref, wc1_ref, bc1_ref, w2_ref, b2_ref, o_ref):
    a = jnp.dot(wc1_ref[...], attn_ref[0].astype(jnp.float32),
                preferred_element_type=jnp.float32) + bc1_ref[...]
    a = a * u_ref[0].astype(jnp.float32)
    y = jnp.dot(w2_ref[...], a, preferred_element_type=jnp.float32) + b2_ref[...]
    o_ref[0] = (y + s_ref[0].astype(jnp.float32)).astype(o_ref.dtype)


def _pick_lane_tile(L, target=4096):
    # Largest lane tile that is a multiple of 128, divides L, and is <= target.
    # target ~4096-8192 is good for v5e/v6e (128 MiB VMEM); ~2048 for v7x.
    # TODO(synk): when L has no 128-multiple divisor this falls back to the full
    # extent (legal, but re-check VMEM for very large L).
    if L <= target:
        return L
    t = (min(L, target) // 128) * 128
    while t >= 128:
        if L % t == 0:
            return t
        t -= 128
    return L


def _tail_call(attn3, u3, x3, wc1, bc1, w2, b2, tl):
    N, C, L = x3.shape
    act_spec = pl.BlockSpec((1, C, tl), lambda n, t: (n, 0, t))
    mat_spec = pl.BlockSpec((C, C), lambda n, t: (0, 0))
    bias_spec = pl.BlockSpec((C, 1), lambda n, t: (0, 0))   # constant index -> single DMA, resident
    return pl.pallas_call(
        _tail_kernel,
        out_shape=jax.ShapeDtypeStruct((N, C, L), x3.dtype),
        grid=(N, L // tl),
        in_specs=[act_spec, act_spec, act_spec, mat_spec, bias_spec, mat_spec, bias_spec],
        out_specs=act_spec,
        compiler_params=pltpu.CompilerParams(
            dimension_semantics=("parallel", "parallel"),
            vmem_limit_bytes=_VMEM_LIMIT),
    )(attn3, u3, x3, wc1, bc1.reshape(C, 1), w2, b2.reshape(C, 1))


# ---------------------------- parameter / weight glue ----------------------------

def band_matrices_hw(w, H, W):
    # w: (C, K, K, K) depthwise weights -> B: (C, K, HW, HW) so that for a fixed
    # kd tap, out[d, v] = sum_j in_padD[d+kd, j] * B[c, kd, j, v] implements the
    # 'same'-zero-padded cross-correlation over the whole (H, W) plane
    # (kh and kw are folded into the contraction dim; H/W boundary handling is
    #  done by the mask, so only the D axis needs an explicit padded buffer).
    C, K = w.shape[0], w.shape[1]
    p = K // 2
    hh = jnp.repeat(jnp.arange(H), W)          # (HW,) plane-row of each flat index
    ww = jnp.tile(jnp.arange(W), H)            # (HW,) plane-col of each flat index
    dh = hh[:, None] - hh[None, :] + p         # (HW_in, HW_out) -> kh tap
    dw = ww[:, None] - ww[None, :] + p         # (HW_in, HW_out) -> kw tap
    valid = (dh >= 0) & (dh < K) & (dw >= 0) & (dw < K)
    dh_c = jnp.clip(dh, 0, K - 1)
    dw_c = jnp.clip(dw, 0, K - 1)
    B = w[:, :, dh_c, dw_c]                    # (C, K, HW, HW)
    return jnp.where(valid[None, None], B, 0.0).astype(jnp.float32)


def init_params(key, C):
    ks = jax.random.split(key, 10)

    def u(k, shape, fan_in):
        bound = 1.0 / math.sqrt(fan_in)
        return jax.random.uniform(k, shape, jnp.float32, -bound, bound)

    return dict(
        w1=u(ks[0], (C, C), C),                 b1=u(ks[1], (C,), C),           # proj_1
        w5=u(ks[2], (C, 5, 5, 5), 5 ** 3),      b5=u(ks[3], (C,), 5 ** 3),      # conv0 (dw 5)
        w11=u(ks[4], (C, 11, 11, 11), 11 ** 3), b11=u(ks[5], (C,), 11 ** 3),    # conv_spatial (dw 11)
        wc1=u(ks[6], (C, C), C),                bc1=u(ks[7], (C,), C),          # conv1
        w2=u(ks[8], (C, C), C),                 b2=u(ks[9], (C,), C),           # proj_2
    )


# ---------------------------- full forward (Pallas) ----------------------------

def spatial_attention_forward(x, p, *, lane_tile_target=4096, approximate_gelu=False):
    # x: (N, C, D, H, W)  -- PyTorch NCDHW
    N, C, D, H, W = x.shape
    L = D * H * W
    HW = H * W

    tl = _pick_lane_tile(L, lane_tile_target)

    # contiguous reshapes only (no transposes)
    x3 = x.reshape(N, C, L)

    # 1) proj_1 + GELU (lane-dense MXU)
    u3 = _head_call(x3, p['w1'], p['b1'], tl, approximate_gelu)

    # 2) fused depthwise 5^3 -> 11^3 on (D, H*W) planes
    B5 = band_matrices_hw(p['w5'], H, W)       # (C, 5,  HW, HW)
    B11 = band_matrices_hw(p['w11'], H, W)     # (C, 11, HW, HW)
    attn4 = _depthwise_call(u3.reshape(N, C, D, HW), B5, B11, p['b5'], p['b11'])

    # 3) conv1 + bias, * u, proj_2 + bias, + shortcut
    out3 = _tail_call(attn4.reshape(N, C, L), u3, x3,
                      p['wc1'], p['bc1'], p['w2'], p['b2'], tl)
    return out3.reshape(N, C, D, H, W)


# ---------------------------- pure-JAX reference (mirrors PyTorch) ----------------------------

def _conv3d(x, w, b, padding, groups=1):
    out = jax.lax.conv_general_dilated(
        x, w, (1, 1, 1), [(padding, padding)] * 3,
        dimension_numbers=('NCDHW', 'OIDHW', 'NCDHW'),
        feature_group_count=groups)
    return out + b[None, :, None, None, None]


def reference_forward(x, p):
    C = x.shape[1]
    shortcut = x
    h = _conv3d(x, p['w1'].reshape(C, C, 1, 1, 1), p['b1'], 0)
    h = jax.nn.gelu(h, approximate=False)
    u = h
    a = _conv3d(h, p['w5'][:, None], p['b5'], 2, groups=C)
    a = _conv3d(a, p['w11'][:, None], p['b11'], 5, groups=C)
    a = _conv3d(a, p['wc1'].reshape(C, C, 1, 1, 1), p['bc1'], 0)
    a = a * u
    out = _conv3d(a, p['w2'].reshape(C, C, 1, 1, 1), p['b2'], 0)
    return out + shortcut


if __name__ == "__main__":
    key = jax.random.PRNGKey(0)
    kx, kp = jax.random.split(key)
    N, C, D, H, W = 2, 4, 8, 8, 8     # d_model=4, 3-D volume 8x8x8
    x = jax.random.normal(kx, (N, C, D, H, W), jnp.float32)
    params = init_params(kp, C)

    fwd = jax.jit(spatial_attention_forward)
    out = jax.block_until_ready(fwd(x, params))
    ref = jax.block_until_ready(reference_forward(x, params))

    assert out.shape == (N, C, D, H, W)
    err = float(jnp.max(jnp.abs(out - ref)))
    assert jnp.allclose(out, ref, atol=2e-3, rtol=2e-3), err
    print("KERNEL_OK")
</pallas_src>

<mosaic_0001>
module attributes {stable_mosaic.version = 11 : i64} {
  func.func @kernel(%arg0: i32, %arg1: i32, %arg2: memref<1x4x512xf32, #tpu.memory_space<vmem>>, %arg3: memref<4x4xf32, #tpu.memory_space<vmem>>, %arg4: memref<4x1xf32, #tpu.memory_space<vmem>>, %arg5: memref<1x4x512xf32, #tpu.memory_space<vmem>>) attributes {dimension_semantics = [#tpu.dimension_semantics<parallel>, #tpu.dimension_semantics<parallel>], iteration_bounds = array<i64: 2, 1>, scalar_prefetch = 0 : i64, scratch_operands = 0 : i64, tpu.core_type = #tpu.core_type<tc>, window_params = [{transform_indices = @transform_0, window_bounds = array<i64: 1, 4, 512>}, {pipeline_mode = #tpu.pipeline_mode<synchronous>, transform_indices = @transform_1, window_bounds = array<i64: 4, 4>}, {pipeline_mode = #tpu.pipeline_mode<synchronous>, transform_indices = @transform_2, window_bounds = array<i64: 4, 1>}, {transform_indices = @transform_3, window_bounds = array<i64: 1, 4, 512>}]} {
    %c0 = arith.constant 0 : index
    %c0_0 = arith.constant 0 : index
    %0 = vector.load %arg3[%c0, %c0_0] : memref<4x4xf32, #tpu.memory_space<vmem>>, vector<4x4xf32>
    %c0_1 = arith.constant 0 : index
    %c0_2 = arith.constant 0 : index
    %c0_3 = arith.constant 0 : index
    %1 = vector.load %arg2[%c0_1, %c0_2, %c0_3] : memref<1x4x512xf32, #tpu.memory_space<vmem>>, vector<1x4x512xf32>
    %2 = vector.shape_cast %1 : vector<1x4x512xf32> to vector<4x512xf32>
    %cst = arith.constant dense<0.000000e+00> : vector<4x512xf32>
    %3 = tpu.matmul %0, %2, %cst {dimension_numbers = #tpu.dot_dimension_numbers<[1], [0], [0], [1], [0, 0, 1, 1], [], []>} : vector<4x4xf32>, vector<4x512xf32>, vector<4x512xf32> -> vector<4x512xf32>
    %c0_4 = arith.constant 0 : index
    %c0_5 = arith.constant 0 : index
    %4 = vector.load %arg4[%c0_4, %c0_5] : memref<4x1xf32, #tpu.memory_space<vmem>>, vector<4x1xf32>
    %5 = vector.broadcast %4 : vector<4x1xf32> to vector<4x512xf32>
    %6 = arith.addf %3, %5 : vector<4x512xf32>
    %cst_6 = arith.constant 5.000000e-01 : f32
    %7 = vector.broadcast %cst_6 : f32 to vector<4x512xf32>
    %8 = arith.mulf %7, %6 : vector<4x512xf32>
    %cst_7 = arith.constant 0.707106769 : f32
    %9 = vector.broadcast %cst_7 : f32 to vector<4x512xf32>
    %10 = arith.mulf %6, %9 : vector<4x512xf32>
    %11 = math.erf %10 : vector<4x512xf32>
    %cst_8 = arith.constant 1.000000e+00 : f32
    %12 = vector.broadcast %cst_8 : f32 to vector<4x512xf32>
    %13 = arith.addf %12, %11 : vector<4x512xf32>
    %14 = arith.mulf %8, %13 : vector<4x512xf32>
    %c0_9 = arith.constant 0 : index
    %c0_10 = arith.constant 0 : index
    %c0_11 = arith.constant 0 : index
    %15 = vector.load %arg5[%c0_9, %c0_10, %c0_11] : memref<1x4x512xf32, #tpu.memory_space<vmem>>, vector<1x4x512xf32>
    %16 = vector.shape_cast %15 : vector<1x4x512xf32> to vector<4x512xf32>
    %17 = vector.shape_cast %14 : vector<4x512xf32> to vector<1x4x512xf32>
    tpu.vector_store %arg5[%c0_9, %c0_10, %c0_11], %17 {strides = array<i32>} : memref<1x4x512xf32, #tpu.memory_space<vmem>>, vector<1x4x512xf32>,
    return
  }
  func.func @transform_0(%arg0: i32, %arg1: i32) -> (i32, i32, i32) {
    %c0_i32 = arith.constant 0 : i32
    %c0_i32_0 = arith.constant 0 : i32
    return %arg0, %c0_i32, %arg1 : i32, i32, i32
  }
  func.func @transform_1(%arg0: i32, %arg1: i32) -> (i32, i32) {
    %c0_i32 = arith.constant 0 : i32
    %c0_i32_0 = arith.constant 0 : i32
    %c0_i32_1 = arith.constant 0 : i32
    return %c0_i32, %c0_i32_0 : i32, i32
  }
  func.func @transform_2(%arg0: i32, %arg1: i32) -> (i32, i32) {
    %c0_i32 = arith.constant 0 : i32
    %c0_i32_0 = arith.constant 0 : i32
    %c0_i32_1 = arith.constant 0 : i32
    return %c0_i32, %c0_i32_0 : i32, i32
  }
  func.func @transform_3(%arg0: i32, %arg1: i32) -> (i32, i32, i32) {
    %c0_i32 = arith.constant 0 : i32
    %c0_i32_0 = arith.constant 0 : i32
    return %arg0, %c0_i32, %arg1 : i32, i32, i32
  }
}

module attributes {stable_mosaic.version = 11 : i64} {
  func.func @_tail_kernel(%arg0: i32, %arg1: i32, %arg2: memref<1x4x512xf32, #tpu.memory_space<vmem>>, %arg3: memref<1x4x512xf32, #tpu.memory_space<vmem>>, %arg4: memref<1x4x512xf32, #tpu.memory_space<vmem>>, %arg5: memref<4x4xf32, #tpu.memory_space<vmem>>, %arg6: memref<4x1xf32, #tpu.memory_space<vmem>>, %arg7: memref<4x4xf32, #tpu.memory_space<vmem>>, %arg8: memref<4x1xf32, #tpu.memory_space<vmem>>, %arg9: memref<1x4x512xf32, #tpu.memory_space<vmem>>) attributes {dimension_semantics = [#tpu.dimension_semantics<parallel>, #tpu.dimension_semantics<parallel>], iteration_bounds = array<i64: 2, 1>, scalar_prefetch = 0 : i64, scratch_operands = 0 : i64, tpu.core_type = #tpu.core_type<tc>, window_params = [{transform_indices = @transform_0, window_bounds = array<i64: 1, 4, 512>}, {transform_indices = @transform_1, window_bounds = array<i64: 1, 4, 512>}, {transform_indices = @transform_2, window_bounds = array<i64: 1, 4, 512>}, {pipeline_mode = #tpu.pipeline_mode<synchronous>, transform_indices = @transform_3, window_bounds = array<i64: 4, 4>}, {pipeline_mode = #tpu.pipeline_mode<synchronous>, transform_indices = @transform_4, window_bounds = array<i64: 4, 1>}, {pipeline_mode = #tpu.pipeline_mode<synchronous>, transform_indices = @transform_5, window_bounds = array<i64: 4, 4>}, {pipeline_mode = #tpu.pipeline_mode<synchronous>, transform_indices = @transform_6, window_bounds = array<i64: 4, 1>}, {transform_indices = @transform_7, window_bounds = array<i64: 1, 4, 512>}]} {
    %c0 = arith.constant 0 : index
    %c0_0 = arith.constant 0 : index
    %0 = vector.load %arg5[%c0, %c0_0] : memref<4x4xf32, #tpu.memory_space<vmem>>, vector<4x4xf32>
    %c0_1 = arith.constant 0 : index
    %c0_2 = arith.constant 0 : index
    %c0_3 = arith.constant 0 : index
    %1 = vector.load %arg2[%c0_1, %c0_2, %c0_3] : memref<1x4x512xf32, #tpu.memory_space<vmem>>, vector<1x4x512xf32>
    %2 = vector.shape_cast %1 : vector<1x4x512xf32> to vector<4x512xf32>
    %cst = arith.constant dense<0.000000e+00> : vector<4x512xf32>
    %3 = tpu.matmul %0, %2, %cst {dimension_numbers = #tpu.dot_dimension_numbers<[1], [0], [0], [1], [0, 0, 1, 1], [], []>} : vector<4x4xf32>, vector<4x512xf32>, vector<4x512xf32> -> vector<4x512xf32>
    %c0_4 = arith.constant 0 : index
    %c0_5 = arith.constant 0 : index
    %4 = vector.load %arg6[%c0_4, %c0_5] : memref<4x1xf32, #tpu.memory_space<vmem>>, vector<4x1xf32>
    %5 = vector.broadcast %4 : vector<4x1xf32> to vector<4x512xf32>
    %6 = arith.addf %3, %5 : vector<4x512xf32>
    %c0_6 = arith.constant 0 : index
    %c0_7 = arith.constant 0 : index
    %c0_8 = arith.constant 0 : index
    %7 = vector.load %arg3[%c0_6, %c0_7, %c0_8] : memref<1x4x512xf32, #tpu.memory_space<vmem>>, vector<1x4x512xf32>
    %8 = vector.shape_cast %7 : vector<1x4x512xf32> to vector<4x512xf32>
    %9 = arith.mulf %6, %8 : vector<4x512xf32>
    %c0_9 = arith.constant 0 : index
    %c0_10 = arith.constant 0 : index
    %10 = vector.load %arg7[%c0_9, %c0_10] : memref<4x4xf32, #tpu.memory_space<vmem>>, vector<4x4xf32>
    %cst_11 = arith.constant dense<0.000000e+00> : vector<4x512xf32>
    %11 = tpu.matmul %10, %9, %cst_11 {dimension_numbers = #tpu.dot_dimension_numbers<[1], [0], [0], [1], [0, 0, 1, 1], [], []>} : vector<4x4xf32>, vector<4x512xf32>, vector<4x512xf32> -> vector<4x512xf32>
    %c0_12 = arith.constant 0 : index
    %c0_13 = arith.constant 0 : index
    %12 = vector.load %arg8[%c0_12, %c0_13] : memref<4x1xf32, #tpu.memory_space<vmem>>, vector<4x1xf32>
    %13 = vector.broadcast %12 : vector<4x1xf32> to vector<4x512xf32>
    %14 = arith.addf %11, %13 : vector<4x512xf32>
    %c0_14 = arith.constant 0 : index
    %c0_15 = arith.constant 0 : index
    %c0_16 = arith.constant 0 : index
    %15 = vector.load %arg4[%c0_14, %c0_15, %c0_16] : memref<1x4x512xf32, #tpu.memory_space<vmem>>, vector<1x4x512xf32>
    %16 = vector.shape_cast %15 : vector<1x4x512xf32> to vector<4x512xf32>
    %17 = arith.addf %14, %16 : vector<4x512xf32>
    %c0_17 = arith.constant 0 : index
    %c0_18 = arith.constant 0 : index
    %c0_19 = arith.constant 0 : index
    %18 = vector.load %arg9[%c0_17, %c0_18, %c0_19] : memref<1x4x512xf32, #tpu.memory_space<vmem>>, vector<1x4x512xf32>
    %19 = vector.shape_cast %18 : vector<1x4x512xf32> to vector<4x512xf32>
    %20 = vector.shape_cast %17 : vector<4x512xf32> to vector<1x4x512xf32>
    tpu.vector_store %arg9[%c0_17, %c0_18, %c0_19], %20 {strides = array<i32>} : memref<1x4x512xf32, #tpu.memory_space<vmem>>, vector<1x4x512xf32>,
    return
  }
  func.func @transform_0(%arg0: i32, %arg1: i32) -> (i32, i32, i32) {
    %c0_i32 = arith.constant 0 : i32
    %c0_i32_0 = arith.constant 0 : i32
    return %arg0, %c0_i32, %arg1 : i32, i32, i32
  }
  func.func @transform_1(%arg0: i32, %arg1: i32) -> (i32, i32, i32) {
    %c0_i32 = arith.constant 0 : i32
    %c0_i32_0 = arith.constant 0 : i32
    return %arg0, %c0_i32, %arg1 : i32, i32, i32
  }
  func.func @transform_2(%arg0: i32, %arg1: i32) -> (i32, i32, i32) {
    %c0_i32 = arith.constant 0 : i32
    %c0_i32_0 = arith.constant 0 : i32
    return %arg0, %c0_i32, %arg1 : i32, i32, i32
  }
  func.func @transform_3(%arg0: i32, %arg1: i32) -> (i32, i32) {
    %c0_i32 = arith.constant 0 : i32
    %c0_i32_0 = arith.constant 0 : i32
    %c0_i32_1 = arith.constant 0 : i32
    return %c0_i32, %c0_i32_0 : i32, i32
  }
  func.func @transform_4(%arg0: i32, %arg1: i32) -> (i32, i32) {
    %c0_i32 = arith.constant 0 : i32
    %c0_i32_0 = arith.constant 0 : i32
    %c0_i32_1 = arith.constant 0 : i32
    return %c0_i32, %c0_i32_0 : i32, i32
  }
  func.func @transform_5(%arg0: i32, %arg1: i32) -> (i32, i32) {
    %c0_i32 = arith.constant 0 : i32
    %c0_i32_0 = arith.constant 0 : i32
    %c0_i32_1 = arith.constant 0 : i32
    return %c0_i32, %c0_i32_0 : i32, i32
  }
  func.func @transform_6(%arg0: i32, %arg1: i32) -> (i32, i32) {
    %c0_i32 = arith.constant 0 : i32
    %c0_i32_0 = arith.constant 0 : i32
    %c0_i32_1 = arith.constant 0 : i32
    return %c0_i32, %c0_i32_0 : i32, i32
  }
  func.func @transform_7(%arg0: i32, %arg1: i32) -> (i32, i32, i32) {
    %c0_i32 = arith.constant 0 : i32
    %c0_i32_0 = arith.constant 0 : i32
    return %arg0, %c0_i32, %arg1 : i32, i32, i32
  }
}

module attributes {stable_mosaic.version = 11 : i64} {
  func.func @kernel(%arg0: i32, %arg1: i32, %arg2: memref<1x1x8x64xf32, #tpu.memory_space<vmem>>, %arg3: memref<4xf32, #tpu.memory_space<smem>>, %arg4: memref<4xf32, #tpu.memory_space<smem>>, %arg5: memref<1x5x64x64xf32, #tpu.memory_space<vmem>>, %arg6: memref<1x11x64x64xf32, #tpu.memory_space<vmem>>, %arg7: memref<1x1x8x64xf32, #tpu.memory_space<vmem>>, %arg8: memref<16x64xf32, #tpu.memory_space<vmem>>, %arg9: memref<24x64xf32, #tpu.memory_space<vmem>>) attributes {dimension_semantics = [#tpu.dimension_semantics<parallel>, #tpu.dimension_semantics<arbitrary>], iteration_bounds = array<i64: 4, 2>, scalar_prefetch = 0 : i64, scratch_operands = 2 : i64, tpu.core_type = #tpu.core_type<tc>, window_params = [{transform_indices = @transform_0, window_bounds = array<i64: 1, 1, 8, 64>}, {transform_indices = @transform_1, window_bounds = array<i64: 4>}, {transform_indices = @transform_2, window_bounds = array<i64: 4>}, {transform_indices = @transform_3, window_bounds = array<i64: 1, 5, 64, 64>}, {transform_indices = @transform_4, window_bounds = array<i64: 1, 11, 64, 64>}, {transform_indices = @transform_5, window_bounds = array<i64: 1, 1, 8, 64>}]} {
    %c0 = arith.constant 0 : index
    %c0_0 = arith.constant 0 : index
    %c0_1 = arith.constant 0 : index
    %c0_2 = arith.constant 0 : index
    %0 = vector.load %arg2[%c0, %c0_0, %c0_1, %c0_2] : memref<1x1x8x64xf32, #tpu.memory_space<vmem>>, vector<1x1x8x64xf32>
    %1 = vector.shape_cast %0 : vector<1x1x8x64xf32> to vector<8x64xf32>
    %cst = arith.constant 0.000000e+00 : f32
    %2 = vector.broadcast %cst : f32 to vector<2x64xf32>
    %c0_3 = arith.constant 0 : index
    %c0_4 = arith.constant 0 : index
    %3 = vector.load %arg8[%c0_3, %c0_4] : memref<16x64xf32, #tpu.memory_space<vmem>>, vector<2x64xf32>
    tpu.vector_store %arg8[%c0_3, %c0_4], %2 {strides = array<i32>} : memref<16x64xf32, #tpu.memory_space<vmem>>, vector<2x64xf32>,
    %cst_5 = arith.constant 0.000000e+00 : f32
    %4 = vector.broadcast %cst_5 : f32 to vector<2x64xf32>
    %c10 = arith.constant 10 : index
    %c0_6 = arith.constant 0 : index
    %5 = vector.load %arg8[%c10, %c0_6] : memref<16x64xf32, #tpu.memory_space<vmem>>, vector<2x64xf32>
    tpu.vector_store %arg8[%c10, %c0_6], %4 {strides = array<i32>} : memref<16x64xf32, #tpu.memory_space<vmem>>, vector<2x64xf32>,
    %c2 = arith.constant 2 : index
    %c0_7 = arith.constant 0 : index
    %6 = vector.load %arg8[%c2, %c0_7] : memref<16x64xf32, #tpu.memory_space<vmem>>, vector<8x64xf32>
    tpu.vector_store %arg8[%c2, %c0_7], %1 {strides = array<i32>} : memref<16x64xf32, #tpu.memory_space<vmem>>, vector<8x64xf32>,
    %7 = arith.index_cast %arg0 : i32 to index
    %8 = memref.load %arg3[%7] : memref<4xf32, #tpu.memory_space<smem>>
    %9 = vector.broadcast %8 : f32 to vector<8x64xf32>
    %c0_8 = arith.constant 0 : index
    %c0_9 = arith.constant 0 : index
    %10 = vector.load %arg8[%c0_8, %c0_9] : memref<16x64xf32, #tpu.memory_space<vmem>>, vector<8x64xf32>
    %c0_10 = arith.constant 0 : index
    %c0_11 = arith.constant 0 : index
    %c0_12 = arith.constant 0 : index
    %c0_13 = arith.constant 0 : index
    %11 = vector.load %arg5[%c0_10, %c0_11, %c0_12, %c0_13] : memref<1x5x64x64xf32, #tpu.memory_space<vmem>>, vector<1x1x64x64xf32>
    %12 = vector.shape_cast %11 : vector<1x1x64x64xf32> to vector<64x64xf32>
    %cst_14 = arith.constant dense<0.000000e+00> : vector<8x64xf32>
    %13 = tpu.matmul %10, %12, %cst_14 {dimension_numbers = #tpu.dot_dimension_numbers<[1], [0], [0], [1], [0, 0, 1, 1], [], []>} : vector<8x64xf32>, vector<64x64xf32>, vector<8x64xf32> -> vector<8x64xf32>
    %14 = arith.addf %9, %13 : vector<8x64xf32>
    %c1 = arith.constant 1 : index
    %c0_15 = arith.constant 0 : index
    %15 = vector.load %arg8[%c1, %c0_15] : memref<16x64xf32, #tpu.memory_space<vmem>>, vector<8x64xf32>
    %c0_16 = arith.constant 0 : index
    %c1_17 = arith.constant 1 : index
    %c0_18 = arith.constant 0 : index
    %c0_19 = arith.constant 0 : index
    %16 = vector.load %arg5[%c0_16, %c1_17, %c0_18, %c0_19] : memref<1x5x64x64xf32, #tpu.memory_space<vmem>>, vector<1x1x64x64xf32>
    %17 = vector.shape_cast %16 : vector<1x1x64x64xf32> to vector<64x64xf32>
    %cst_20 = arith.constant dense<0.000000e+00> : vector<8x64xf32>
    %18 = tpu.matmul %15, %17, %cst_20 {dimension_numbers = #tpu.dot_dimension_numbers<[1], [0], [0], [1], [0, 0, 1, 1], [], []>} : vector<8x64xf32>, vector<64x64xf32>, vector<8x64xf32> -> vector<8x64xf32>
    %19 = arith.addf %14, %18 : vector<8x64xf32>
    %c2_21 = arith.constant 2 : index
    %c0_22 = arith.constant 0 : index
    %20 = vector.load %arg8[%c2_21, %c0_22] : memref<16x64xf32, #tpu.memory_space<vmem>>, vector<8x64xf32>
    %c0_23 = arith.constant 0 : index
    %c2_24 = arith.constant 2 : index
    %c0_25 = arith.constant 0 : index
    %c0_26 = arith.constant 0 : index
    %21 = vector.load %arg5[%c0_23, %c2_24, %c0_25, %c0_26] : memref<1x5x64x64xf32, #tpu.memory_space<vmem>>, vector<1x1x64x64xf32>
    %22 = vector.shape_cast %21 : vector<1x1x64x64xf32> to vector<64x64xf32>
    %cst_27 = arith.constant dense<0.000000e+00> : vector<8x64xf32>
    %23 = tpu.matmul %20, %22, %cst_27 {dimension_numbers = #tpu.dot_dimension_numbers<[1], [0], [0], [1], [0, 0, 1, 1], [], []>} : vector<8x64xf32>, vector<64x64xf32>, vector<8x64xf32> -> vector<8x64xf32>
    %24 = arith.addf %19, %23 : vector<8x64xf32>
    %c3 = arith.constant 3 : index
    %c0_28 = arith.constant 0 : index
    %25 = vector.load %arg8[%c3, %c0_28] : memref<16x64xf32, #tpu.memory_space<vmem>>, vector<8x64xf32>
    %c0_29 = arith.constant 0 : index
    %c3_30 = arith.constant 3 : index
    %c0_31 = arith.constant 0 : index
    %c0_32 = arith.constant 0 : index
    %26 = vector.load %arg5[%c0_29, %c3_30, %c0_31, %c0_32] : memref<1x5x64x64xf32, #tpu.memory_space<vmem>>, vector<1x1x64x64xf32>
    %27 = vector.shape_cast %26 : vector<1x1x64x64xf32> to vector<64x64xf32>
    %cst_33 = arith.constant dense<0.000000e+00> : vector<8x64xf32>
    %28 = tpu.matmul %25, %27, %cst_33 {dimension_numbers = #tpu.dot_dimension_numbers<[1], [0], [0], [1], [0, 0, 1, 1], [], []>} : vector<8x64xf32>, vector<64x64xf32>, vector<8x64xf32> -> vector<8x64xf32>
    %29 = arith.addf %24, %28 : vector<8x64xf32>
    %c4 = arith.constant 4 : index
    %c0_34 = arith.constant 0 : index
    %30 = vector.load %arg8[%c4, %c0_34] : memref<16x64xf32, #tpu.memory_space<vmem>>, vector<8x64xf32>
    %c0_35 = arith.constant 0 : index
    %c4_36 = arith.constant 4 : index
    %c0_37 = arith.constant 0 : index
    %c0_38 = arith.constant 0 : index
    %31 = vector.load %arg5[%c0_35, %c4_36, %c0_37, %c0_38] : memref<1x5x64x64xf32, #tpu.memory_space<vmem>>, vector<1x1x64x64xf32>
    %32 = vector.shape_cast %31 : vector<1x1x64x64xf32> to vector<64x64xf32>
    %cst_39 = arith.constant dense<0.000000e+00> : vector<8x64xf32>
    %33 = tpu.matmul %30, %32, %cst_39 {dimension_numbers = #tpu.dot_dimension_numbers<[1], [0], [0], [1], [0, 0, 1, 1], [], []>} : vector<8x64xf32>, vector<64x64xf32>, vector<8x64xf32> -> vector<8x64xf32>
    %34 = arith.addf %29, %33 : vector<8x64xf32>
    %cst_40 = arith.constant 0.000000e+00 : f32
    %35 = vector.broadcast %cst_40 : f32 to vector<5x64xf32>
    %c0_41 = arith.constant 0 : index
    %c0_42 = arith.constant 0 : index
    %36 = vector.load %arg9[%c0_41, %c0_42] : memref<24x64xf32, #tpu.memory_space<vmem>>, vector<5x64xf32>
    tpu.vector_store %arg9[%c0_41, %c0_42], %35 {strides = array<i32>} : memref<24x64xf32, #tpu.memory_space<vmem>>, vector<5x64xf32>,
    %cst_43 = arith.constant 0.000000e+00 : f32
    %37 = vector.broadcast %cst_43 : f32 to vector<5x64xf32>
    %c13 = arith.constant 13 : index
    %c0_44 = arith.constant 0 : index
    %38 = vector.load %arg9[%c13, %c0_44] : memref<24x64xf32, #tpu.memory_space<vmem>>, vector<5x64xf32>
    tpu.vector_store %arg9[%c13, %c0_44], %37 {strides = array<i32>} : memref<24x64xf32, #tpu.memory_space<vmem>>, vector<5x64xf32>,
    %c5 = arith.constant 5 : index
    %c0_45 = arith.constant 0 : index
    %39 = vector.load %arg9[%c5, %c0_45] : memref<24x64xf32, #tpu.memory_space<vmem>>, vector<8x64xf32>
    tpu.vector_store %arg9[%c5, %c0_45], %34 {strides = array<i32>} : memref<24x64xf32, #tpu.memory_space<vmem>>, vector<8x64xf32>,
    %40 = arith.index_cast %arg0 : i32 to index
    %41 = memref.load %arg4[%40] : memref<4xf32, #tpu.memory_space<smem>>
    %42 = vector.broadcast %41 : f32 to vector<8x64xf32>
    %c0_46 = arith.constant 0 : index
    %c0_47 = arith.constant 0 : index
    %43 = vector.load %arg9[%c0_46, %c0_47] : memref<24x64xf32, #tpu.memory_space<vmem>>, vector<8x64xf32>
    %c0_48 = arith.constant 0 : index
    %c0_49 = arith.constant 0 : index
    %c0_50 = arith.constant 0 : index
    %c0_51 = arith.constant 0 : index
    %44 = vector.load %arg6[%c0_48, %c0_49, %c0_50, %c0_51] : memref<1x11x64x64xf32, #tpu.memory_space<vmem>>, vector<1x1x64x64xf32>
    %45 = vector.shape_cast %44 : vector<1x1x64x64xf32> to vector<64x64xf32>
    %cst_52 = arith.constant dense<0.000000e+00> : vector<8x64xf32>
    %46 = tpu.matmul %43, %45, %cst_52 {dimension_numbers = #tpu.dot_dimension_numbers<[1], [0], [0], [1], [0, 0, 1, 1], [], []>} : vector<8x64xf32>, vector<64x64xf32>, vector<8x64xf32> -> vector<8x64xf32>
    %47 = arith.addf %42, %46 : vector<8x64xf32>
    %c1_53 = arith.constant 1 : index
    %c0_54 = arith.constant 0 : index
    %48 = vector.load %arg9[%c1_53, %c0_54] : memref<24x64xf32, #tpu.memory_space<vmem>>, vector<8x64xf32>
    %c0_55 = arith.constant 0 : index
    %c1_56 = arith.constant 1 : index
    %c0_57 = arith.constant 0 : index
    %c0_58 = arith.constant 0 : index
    %49 = vector.load %arg6[%c0_55, %c1_56, %c0_57, %c0_58] : memref<1x11x64x64xf32, #tpu.memory_space<vmem>>, vector<1x1x64x64xf32>
    %50 = vector.shape_cast %49 : vector<1x1x64x64xf32> to vector<64x64xf32>
    %cst_59 = arith.constant dense<0.000000e+00> : vector<8x64xf32>
    %51 = tpu.matmul %48, %50, %cst_59 {dimension_numbers = #tpu.dot_dimension_numbers<[1], [0], [0], [1], [0, 0, 1, 1], [], []>} : vector<8x64xf32>, vector<64x64xf32>, vector<8x64xf32> -> vector<8x64xf32>
    %52 = arith.addf %47, %51 : vector<8x64xf32>
    %c2_60 = arith.constant 2 : index
    %c0_61 = arith.constant 0 : index
    %53 = vector.load %arg9[%c2_60, %c0_61] : memref<24x64xf32, #tpu.memory_space<vmem>>, vector<8x64xf32>
    %c0_62 = arith.constant 0 : index
    %c2_63 = arith.constant 2 : index
    %c0_64 = arith.constant 0 : index
    %c0_65 = arith.constant 0 : index
    %54 = vector.load %arg6[%c0_62, %c2_63, %c0_64, %c0_65] : memref<1x11x64x64xf32, #tpu.memory_space<vmem>>, vector<1x1x64x64xf32>
    %55 = vector.shape_cast %54 : vector<1x1x64x64xf32> to vector<64x64xf32>
    %cst_66 = arith.constant dense<0.000000e+00> : vector<8x64xf32>
    %56 = tpu.matmul %53, %55, %cst_66 {dimension_numbers = #tpu.dot_dimension_numbers<[1], [0], [0], [1], [0, 0, 1, 1], [], []>} : vector<8x64xf32>, vector<64x64xf32>, vector<8x64xf32> -> vector<8x64xf32>
    %57 = arith.addf %52, %56 : vector<8x64xf32>
    %c3_67 = arith.constant 3 : index
    %c0_68 = arith.constant 0 : index
    %58 = vector.load %arg9[%c3_67, %c0_68] : memref<24x64xf32, #tpu.memory_space<vmem>>, vector<8x64xf32>
    %c0_69 = arith.constant 0 : index
    %c3_70 = arith.constant 3 : index
    %c0_71 = arith.constant 0 : index
    %c0_72 = arith.constant 0 : index
    %59 = vector.load %arg6[%c0_69, %c3_70, %c0_71, %c0_72] : memref<1x11x64x64xf32, #tpu.memory_space<vmem>>, vector<1x1x64x64xf32>
    %60 = vector.shape_cast %59 : vector<1x1x64x64xf32> to vector<64x64xf32>
    %cst_73 = arith.constant dense<0.000000e+00> : vector<8x64xf32>
    %61 = tpu.matmul %58, %60, %cst_73 {dimension_numbers = #tpu.dot_dimension_numbers<[1], [0], [0], [1], [0, 0, 1, 1], [], []>} : vector<8x64xf32>, vector<64x64xf32>, vector<8x64xf32> -> vector<8x64xf32>
    %62 = arith.addf %57, %61 : vector<8x64xf32>
    %c4_74 = arith.constant 4 : index
    %c0_75 = arith.constant 0 : index
    %63 = vector.load %arg9[%c4_74, %c0_75] : memref<24x64xf32, #tpu.memory_space<vmem>>, vector<8x64xf32>
    %c0_76 = arith.constant 0 : index
    %c4_77 = arith.constant 4 : index
    %c0_78 = arith.constant 0 : index
    %c0_79 = arith.constant 0 : index
    %64 = vector.load %arg6[%c0_76, %c4_77, %c0_78, %c0_79] : memref<1x11x64x64xf32, #tpu.memory_space<vmem>>, vector<1x1x64x64xf32>
    %65 = vector.shape_cast %64 : vector<1x1x64x64xf32> to vector<64x64xf32>
    %cst_80 = arith.constant dense<0.000000e+00> : vector<8x64xf32>
    %66 = tpu.matmul %63, %65, %cst_80 {dimension_numbers = #tpu.dot_dimension_numbers<[1], [0], [0], [1], [0, 0, 1, 1], [], []>} : vector<8x64xf32>, vector<64x64xf32>, vector<8x64xf32> -> vector<8x64xf32>
    %67 = arith.addf %62, %66 : vector<8x64xf32>
    %c5_81 = arith.constant 5 : index
    %c0_82 = arith.constant 0 : index
    %68 = vector.load %arg9[%c5_81, %c0_82] : memref<24x64xf32, #tpu.memory_space<vmem>>, vector<8x64xf32>
    %c0_83 = arith.constant 0 : index
    %c5_84 = arith.constant 5 : index
    %c0_85 = arith.constant 0 : index
    %c0_86 = arith.constant 0 : index
    %69 = vector.load %arg6[%c0_83, %c5_84, %c0_85, %c0_86] : memref<1x11x64x64xf32, #tpu.memory_space<vmem>>, vector<1x1x64x64xf32>
    %70 = vector.shape_cast %69 : vector<1x1x64x64xf32> to vector<64x64xf32>
    %cst_87 = arith.constant dense<0.000000e+00> : vector<8x64xf32>
    %71 = tpu.matmul %68, %70, %cst_87 {dimension_numbers = #tpu.dot_dimension_numbers<[1], [0], [0], [1], [0, 0, 1, 1], [], []>} : vector<8x64xf32>, vector<64x64xf32>, vector<8x64xf32> -> vector<8x64xf32>
    %72 = arith.addf %67, %71 : vector<8x64xf32>
    %c6 = arith.constant 6 : index
    %c0_88 = arith.constant 0 : index
    %73 = vector.load %arg9[%c6, %c0_88] : memref<24x64xf32, #tpu.memory_space<vmem>>, vector<8x64xf32>
    %c0_89 = arith.constant 0 : index
    %c6_90 = arith.constant 6 : index
    %c0_91 = arith.constant 0 : index
    %c0_92 = arith.constant 0 : index
    %74 = vector.load %arg6[%c0_89, %c6_90, %c0_91, %c0_92] : memref<1x11x64x64xf32, #tpu.memory_space<vmem>>, vector<1x1x64x64xf32>
    %75 = vector.shape_cast %74 : vector<1x1x64x64xf32> to vector<64x64xf32>
    %cst_93 = arith.constant dense<0.000000e+00> : vector<8x64xf32>
    %76 = tpu.matmul %73, %75, %cst_93 {dimension_numbers = #tpu.dot_dimension_numbers<[1], [0], [0], [1], [0, 0, 1, 1], [], []>} : vector<8x64xf32>, vector<64x64xf32>, vector<8x64xf32> -> vector<8x64xf32>
    %77 = arith.addf %72, %76 : vector<8x64xf32>
    %c7 = arith.constant 7 : index
    %c0_94 = arith.constant 0 : index
    %78 = vector.load %arg9[%c7, %c0_94] : memref<24x64xf32, #tpu.memory_space<vmem>>, vector<8x64xf32>
    %c0_95 = arith.constant 0 : index
    %c7_96 = arith.constant 7 : index
    %c0_97 = arith.constant 0 : index
    %c0_98 = arith.constant 0 : index
    %79 = vector.load %arg6[%c0_95, %c7_96, %c0_97, %c0_98] : memref<1x11x64x64xf32, #tpu.memory_space<vmem>>, vector<1x1x64x64xf32>
    %80 = vector.shape_cast %79 : vector<1x1x64x64xf32> to vector<64x64xf32>
    %cst_99 = arith.constant dense<0.000000e+00> : vector<8x64xf32>
    %81 = tpu.matmul %78, %80, %cst_99 {dimension_numbers = #tpu.dot_dimension_numbers<[1], [0], [0], [1], [0, 0, 1, 1], [], []>} : vector<8x64xf32>, vector<64x64xf32>, vector<8x64xf32> -> vector<8x64xf32>
    %82 = arith.addf %77, %81 : vector<8x64xf32>
    %c8 = arith.constant 8 : index
    %c0_100 = arith.constant 0 : index
    %83 = vector.load %arg9[%c8, %c0_100] : memref<24x64xf32, #tpu.memory_space<vmem>>, vector<8x64xf32>
    %c0_101 = arith.constant 0 : index
    %c8_102 = arith.constant 8 : index
    %c0_103 = arith.constant 0 : index
    %c0_104 = arith.constant 0 : index
    %84 = vector.load %arg6[%c0_101, %c8_102, %c0_103, %c0_104] : memref<1x11x64x64xf32, #tpu.memory_space<vmem>>, vector<1x1x64x64xf32>
    %85 = vector.shape_cast %84 : vector<1x1x64x64xf32> to vector<64x64xf32>
    %cst_105 = arith.constant dense<0.000000e+00> : vector<8x64xf32>
    %86 = tpu.matmul %83, %85, %cst_105 {dimension_numbers = #tpu.dot_dimension_numbers<[1], [0], [0], [1], [0, 0, 1, 1], [], []>} : vector<8x64xf32>, vector<64x64xf32>, vector<8x64xf32> -> vector<8x64xf32>
    %87 = arith.addf %82, %86 : vector<8x64xf32>
    %c9 = arith.constant 9 : index
    %c0_106 = arith.constant 0 : index
    %88 = vector.load %arg9[%c9, %c0_106] : memref<24x64xf32, #tpu.memory_space<vmem>>, vector<8x64xf32>
    %c0_107 = arith.constant 0 : index
    %c9_108 = arith.constant 9 : index
    %c0_109 = arith.constant 0 : index
    %c0_110 = arith.constant 0 : index
    %89 = vector.load %arg6[%c0_107, %c9_108, %c0_109, %c0_110] : memref<1x11x64x64xf32, #tpu.memory_space<vmem>>, vector<1x1x64x64xf32>
    %90 = vector.shape_cast %89 : vector<1x1x64x64xf32> to vector<64x64xf32>
    %cst_111 = arith.constant dense<0.000000e+00> : vector<8x64xf32>
    %91 = tpu.matmul %88, %90, %cst_111 {dimension_numbers = #tpu.dot_dimension_numbers<[1], [0], [0], [1], [0, 0, 1, 1], [], []>} : vector<8x64xf32>, vector<64x64xf32>, vector<8x64xf32> -> vector<8x64xf32>
    %92 = arith.addf %87, %91 : vector<8x64xf32>
    %c10_112 = arith.constant 10 : index
    %c0_113 = arith.constant 0 : index
    %93 = vector.load %arg9[%c10_112, %c0_113] : memref<24x64xf32, #tpu.memory_space<vmem>>, vector<8x64xf32>
    %c0_114 = arith.constant 0 : index
    %c10_115 = arith.constant 10 : index
    %c0_116 = arith.constant 0 : index
    %c0_117 = arith.constant 0 : index
    %94 = vector.load %arg6[%c0_114, %c10_115, %c0_116, %c0_117] : memref<1x11x64x64xf32, #tpu.memory_space<vmem>>, vector<1x1x64x64xf32>
    %95 = vector.shape_cast %94 : vector<1x1x64x64xf32> to vector<64x64xf32>
    %cst_118 = arith.constant dense<0.000000e+00> : vector<8x64xf32>
    %96 = tpu.matmul %93, %95, %cst_118 {dimension_numbers = #tpu.dot_dimension_numbers<[1], [0], [0], [1], [0, 0, 1, 1], [], []>} : vector<8x64xf32>, vector<64x64xf32>, vector<8x64xf32> -> vector<8x64xf32>
    %97 = arith.addf %92, %96 : vector<8x64xf32>
    %c0_119 = arith.constant 0 : index
    %c0_120 = arith.constant 0 : index
    %c0_121 = arith.constant 0 : index
    %c0_122 = arith.constant 0 : index
    %98 = vector.load %arg7[%c0_119, %c0_120, %c0_121, %c0_122] : memref<1x1x8x64xf32, #tpu.memory_space<vmem>>, vector<1x1x8x64xf32>
    %99 = vector.shape_cast %98 : vector<1x1x8x64xf32> to vector<8x64xf32>
    %100 = vector.shape_cast %97 : vector<8x64xf32> to vector<1x1x8x64xf32>
    tpu.vector_store %arg7[%c0_119, %c0_120, %c0_121, %c0_122], %100 {strides = array<i32>} : memref<1x1x8x64xf32, #tpu.memory_space<vmem>>, vector<1x1x8x64xf32>,
    return
  }
  func.func @transform_0(%arg0: i32, %arg1: i32) -> (i32, i32, i32, i32) {
    %c0_i32 = arith.constant 0 : i32
    %c0_i32_0 = arith.constant 0 : i32
    %c0_i32_1 = arith.constant 0 : i32
    return %arg1, %arg0, %c0_i32, %c0_i32_0 : i32, i32, i32, i32
  }
  func.func @transform_1(%arg0: i32, %arg1: i32) -> i32 {
    %c0_i32 = arith.constant 0 : i32
    %c0_i32_0 = arith.constant 0 : i32
    return %c0_i32 : i32
  }
  func.func @transform_2(%arg0: i32, %arg1: i32) -> i32 {
    %c0_i32 = arith.constant 0 : i32
    %c0_i32_0 = arith.constant 0 : i32
    return %c0_i32 : i32
  }
  func.func @transform_3(%arg0: i32, %arg1: i32) -> (i32, i32, i32, i32) {
    %c0_i32 = arith.constant 0 : i32
    %c0_i32_0 = arith.constant 0 : i32
    %c0_i32_1 = arith.constant 0 : i32
    %c0_i32_2 = arith.constant 0 : i32
    return %arg0, %c0_i32, %c0_i32_0, %c0_i32_1 : i32, i32, i32, i32
  }
  func.func @transform_4(%arg0: i32, %arg1: i32) -> (i32, i32, i32, i32) {
    %c0_i32 = arith.constant 0 : i32
    %c0_i32_0 = arith.constant 0 : i32
    %c0_i32_1 = arith.constant 0 : i32
    %c0_i32_2 = arith.constant 0 : i32
    return %arg0, %c0_i32, %c0_i32_0, %c0_i32_1 : i32, i32, i32, i32
  }
  func.func @transform_5(%arg0: i32, %arg1: i32) -> (i32, i32, i32, i32) {
    %c0_i32 = arith.constant 0 : i32
    %c0_i32_0 = arith.constant 0 : i32
    %c0_i32_1 = arith.constant 0 : i32
    return %arg1, %arg0, %c0_i32, %c0_i32_0 : i32, i32, i32, i32
  }
}

</mosaic_0001>

<bundles_post_ra>
// kernel: spatial_attention_forward.3
= control target key start
LH: loop header
LB: loop body
LE: loop exit
PB: predicated region body
PF: predicated region fallthrough
CT: control target
= control target key end

     0   :  { %s597_s12 = smov 0   ;;  %s599_s13 = smov 0   ;;  %s643_s0 = inlined_call_operand.vmem [shape: f32[2,4,512], index: 0, kind: input, shape index: {}]   ;;  %s644_s1 = inlined_call_operand.vmem [shape: f32[4,4], index: 1, kind: input, shape index: {}]   ;;  %s645_s2 = inlined_call_operand.vmem [shape: f32[4,1], index: 2, kind: input, shape index: {}]   ;;  %s646_s3 = inlined_call_operand.vmem [shape: f32[2,4,512], index: 3, kind: output, shape index: {}]  }
   0x1   :  { %s601_s14 = smov 0  }
   0x2 LB: > { %s25_s15 = sadd.s32 1, %s569_s13  ;;  %p499_p0 = scmp.ge.s32.totalorder %s573_s14, 1  ;;  %s573_s14 = sphi %s601_s14, %s13_s14   ;;  %s569_s13 = sphi %s599_s13, %s648_s13   ;;  %s565_s12 = sphi %s597_s12, %s647_s12  }
   0x3   : > { %p27_p1 = scmp.ge.s32.totalorder %s25_s15, 2  ;;  %p158_p2 = scmp.lt.s32.totalorder %s573_s14, 3 }
   0x5   : > { %s650_s15 = smov (%p27_p1, %s25_s15), 0  ;;  %p159_p3 = pnand %p499_p0, %p158_p2 }
   0x6   : > { %p191_p4 = scmp.lt.s32.totalorder (!%p159_p3), %s565_s12, 1  ;;  %v575_v0 = vmov (!%p159_p3), 0.0   ;;  %v213_v1 = vld [vmem:[%s645_s2] sm:$0xf] (!%p159_p3)  ;;  %v576_v2 = vmov (!%p159_p3), 0   ;;  %vm227_vm0 = vcmask (!%p159_p3), 1043456  }
   0x7   : > { %162 = sbr.rel (%p159_p3) target bundleno = 259 (0x103), region = 32  ;;  %300 = vmatprep.mubr.f32.mxu0 (!%p159_p3), %v575_v0  ;;  %371 = vmatprep.mubr.f32.mxu1 (!%p159_p3), %v575_v0  ;;  %v210_v7 = vld [vmem:[%s644_s1] sm:$0xf] (!%p159_p3)  ;;  %vm223_vm1 = vcmask (!%p159_p3), 31744  }
   0x8   : > { %540 = vset.pattern.permute.xlu0 (!%p159_p3), %v576_v2 }
   0x9   : > { %216 = vperm.xlu0 (!%p159_p3), %540, %v213_v1  }
   0xe   : > { %s652_s12 = smov (!%p191_p4, %s565_s12), 1 }
   0xf   : > { %s512_s18 = sshll.u32 %s652_s12, 4 }
  0x10   : > { %s198_s21 = scalar_lea.vmem %s643_s0, %s512_s18  ;;  %s208_s26 = scalar_lea.vmem %s646_s3, %s512_s18 }
  0x11   : > { %v211_v3 = vld [vmem:[%s198_s21] sm:$0xff]  ;;  %v212_v4 = vld [vmem:[%s198_s21 + $0x8] sm:$0xff] }
  0x12   : > { %v221_v5 = vcombine.high %v211_v3, %v211_v3  ;;  %v222_v6 = vcombine.high %v212_v4, %v212_v4 }
  0x14   : > { %504 = vmatprep.subr.msk.mxu0 %vm227_vm0, %v221_v5  ;;  %507 = vmatprep.subr.msk.mxu1 %vm227_vm0, %v222_v6 }
  0x15   : > { %505 = vmatpush1.msk.msra.mxu0 %vm227_vm0, %v211_v3  ;;  %508 = vmatpush1.msk.msra.mxu1 %vm227_vm0, %v212_v4 }
  0x16   : > { %506 = vmatmul.mubr.msk.f32.vlgmr.msra.gmra.mrb[0].mxu0 %vm223_vm1, %v210_v7  ;;  %509 = vmatmul.mubr.msk.f32.vlgmr.msra.gmra.mrb[0].mxu1 %vm223_vm1, %v210_v7 }
  0x88   : > { %v217_v8 = vpop.permute.xlu0 %216 }
  0xe9   : > { %v302_v9 = vpop.f32.mrb[0].mxu0  ;;  %v373_v10 = vpop.f32.mrb[0].mxu1 }
  0xea   : > { %v303_v11 = vadd.f32 %v302_v9, %v217_v8  ;;  %v374_v12 = vadd.f32 %v373_v10, %v217_v8  ;;  %v304_v13 = vpop.f32.mrb[1].mxu0  ;;  %v375_v14 = vpop.f32.mrb[1].mxu1 }
  0xeb   : > { %v305_v15 = vadd.f32 %v304_v13, %v217_v8  ;;  %v376_v16 = vadd.f32 %v375_v14, %v217_v8 }
  0xec   : > { %v382_v17 = vmul.f32 0.70710677, %v303_v11  ;;  %v384_v18 = vmul.f32 0.70710677, %v374_v12  ;;  %v378_v23 = vmul.f32 0.5, %v303_v11  ;;  %v380_v26 = vmul.f32 0.5, %v374_v12 }
  0xed   : > { %v383_v19 = vmul.f32 0.70710677, %v305_v15  ;;  %v385_v20 = vmul.f32 0.70710677, %v376_v16  ;;  %v379_v30 = vmul.f32 0.5, %v305_v15  ;;  %v381_v33 = vmul.f32 0.5, %v376_v16 }
  0xee   : > { %543 = verf.f32 %v382_v17 }
  0xef   : > { %545 = verf.f32 %v384_v18 }
  0xf0   : > { %547 = verf.f32 %v383_v19 }
  0xf1   : > { %549 = verf.f32 %v385_v20 }
  0xf8   : > { %v544_v21 = vpop.eup %543 }
  0xf9   : > { %v546_v22 = vpop.eup %545  ;;  %v390_v24 = vadd.f32 1.0, %v544_v21 }
  0xfa   : > { %v548_v25 = vpop.eup %547  ;;  %v392_v27 = vadd.f32 1.0, %v546_v22 }
  0xfb   : > { %v550_v28 = vpop.eup %549  ;;  %v394_v29 = vmul.f32 %v390_v24, %v378_v23  ;;  %v391_v31 = vadd.f32 1.0, %v548_v25 }
  0xfc   : > { %v396_v32 = vmul.f32 %v392_v27, %v380_v26  ;;  %v393_v34 = vadd.f32 1.0, %v550_v28 }
  0xfd   : > { %v395_v35 = vmul.f32 %v391_v31, %v379_v30 }
  0xfe   : > { %v397_v36 = vmul.f32 %v393_v34, %v381_v33 }
  0xff   : > { %v402_v37 = vcombine.low %v394_v29, %v395_v35 }
 0x100   : > { %v403_v38 = vcombine.low %v396_v32, %v397_v36 }
 0x101   : > { %406 = vst [vmem:[%s208_s26] sm:$0xff] %v402_v37 }
 0x102   : > { %407 = vst [vmem:[%s208_s26 + $0x8] sm:$0xff] %v403_v38 }
 0x103 PF: > { %s13_s14 = sadd.s32 1, %s573_s14   ;;  %s647_s12 = smov %s569_s13 }
 0x104   : > { %p10_p5 = scmp.ge.s32.totalorder %s13_s14, 4   ;;  %s648_s13 = smov %s650_s15 }
 0x106   :  { %12 = sbr.rel (!%p10_p5) target bundleno = 2 (0x2), region = 62 }

// kernel: spatial_attention_forward.5
= control target key start
LH: loop header
LB: loop body
LE: loop exit
PB: predicated region body
PF: predicated region fallthrough
CT: control target
= control target key end

     0   :  { %s1009_s24 = smov 0   ;;  %s1011_s25 = smov 0   ;;  %s1078_s0 = inlined_call_operand.vmem [shape: f32[2,4,512], index: 0, kind: input, shape index: {}]   ;;  %s1079_s1 = inlined_call_operand.vmem [shape: f32[2,4,512], index: 1, kind: input, shape index: {}]   ;;  %s1080_s2 = inlined_call_operand.vmem [shape: f32[2,4,512], index: 2, kind: input, shape index: {}]   ;;  %s1081_s3 = inlined_call_operand.vmem [shape: f32[4,4], index: 3, kind: input, shape index: {}]   ;;  %s1082_s4 = inlined_call_operand.vmem [shape: f32[4,1], index: 4, kind: input, shape index: {}]   ;;  %s1083_s5 = inlined_call_operand.vmem [shape: f32[4,4], index: 5, kind: input, shape index: {}]   ;;  %s1084_s6 = inlined_call_operand.vmem [shape: f32[4,1], index: 6, kind: input, shape index: {}]   ;;  %s1085_s7 = inlined_call_operand.vmem [shape: f32[2,4,512], index: 7, kind: output, shape index: {}]  }
   0x1   :  { %s1013_s26 = smov 0  }
   0x2 LB: > { %s29_s27 = sadd.s32 1, %s961_s25  ;;  %p883_p0 = scmp.ge.s32.totalorder %s965_s26, 1  ;;  %s965_s26 = sphi %s1013_s26, %s17_s26   ;;  %s961_s25 = sphi %s1011_s25, %s1087_s25   ;;  %s957_s24 = sphi %s1009_s24, %s1086_s24  }
   0x3   : > { %p31_p1 = scmp.ge.s32.totalorder %s29_s27, 2  ;;  %p292_p2 = scmp.lt.s32.totalorder %s965_s26, 3 }
   0x5   : > { %s1089_s27 = smov (%p31_p1, %s29_s27), 0  ;;  %p293_p3 = pnand %p883_p0, %p292_p2 }
   0x6   : > { %p351_p4 = scmp.lt.s32.totalorder (!%p293_p3), %s957_s24, 1  ;;  %v967_v0 = vmov (!%p293_p3), 0.0   ;;  %v393_v1 = vld [vmem:[%s1082_s4] sm:$0xf] (!%p293_p3)  ;;  %v968_v2 = vmov (!%p293_p3), 0   ;;  %vm407_vm0 = vcmask (!%p293_p3), 1043456  }
   0x7   : > { %296 = sbr.rel (%p293_p3) target bundleno = 461 (0x1cd), region = 48  ;;  %480 = vmatprep.mubr.f32.mxu0 (!%p293_p3), %v967_v0  ;;  %551 = vmatprep.mubr.f32.mxu1 (!%p293_p3), %v967_v0  ;;  %v571_v3 = vld [vmem:[%s1084_s6] sm:$0xf] (!%p293_p3)  ;;  %vm403_vm1 = vcmask (!%p293_p3), 31744  }
   0x8   : > { %936 = vset.pattern.permute.xlu0 (!%p293_p3), %v968_v2  ;;  %v390_v8 = vld [vmem:[%s1081_s3] sm:$0xf] (!%p293_p3) }
   0x9   : > { %396 = vperm.xlu0 (!%p293_p3), %936, %v393_v1   ;;  %v570_v26 = vld [vmem:[%s1083_s5] sm:$0xf] (!%p293_p3) }
   0xd   : > { %574 = vperm.xlu0 (!%p293_p3), %936, %v571_v3  }
   0xe   : > { %s1091_s24 = smov (!%p351_p4, %s957_s24), 1 }
   0xf   : > { %s1030_s30 = sshll.u32 %s1091_s24, 4 }
  0x10   : > { %s358_s12 = scalar_lea.vmem %s1078_s0, %s1030_s30  ;;  %s368_s17 = scalar_lea.vmem %s1079_s1, %s1030_s30 }
  0x11   : > { %v391_v4 = vld [vmem:[%s358_s12] sm:$0xff]  ;;  %v392_v5 = vld [vmem:[%s358_s12 + $0x8] sm:$0xff]  ;;  %s378_s22 = scalar_lea.vmem %s1080_s2, %s1030_s30  ;;  %s388_s28 = scalar_lea.vmem %s1085_s7, %s1030_s30 }
  0x12   : > { %v401_v6 = vcombine.high %v391_v4, %v391_v4  ;;  %v402_v7 = vcombine.high %v392_v5, %v392_v5  ;;  %v558_v9 = vld [vmem:[%s368_s17] sm:$0xff]  ;;  %v559_v10 = vld [vmem:[%s368_s17 + $0x8] sm:$0xff] }
  0x13   : > { %v562_v14 = vcombine.high %v558_v9, %v558_v9  ;;  %v563_v15 = vcombine.high %v559_v10, %v559_v10  ;;  %v734_v27 = vld [vmem:[%s378_s22] sm:$0xff]  ;;  %v735_v28 = vld [vmem:[%s378_s22 + $0x8] sm:$0xff] }
  0x14   : > { %892 = vmatprep.subr.msk.mxu0 %vm407_vm0, %v401_v6  ;;  %895 = vmatprep.subr.msk.mxu1 %vm407_vm0, %v402_v7  ;;  %v738_v32 = vcombine.high %v734_v27, %v734_v27  ;;  %v739_v33 = vcombine.high %v735_v28, %v735_v28 }
  0x15   : > { %893 = vmatpush1.msk.msra.mxu0 %vm407_vm0, %v391_v4  ;;  %896 = vmatpush1.msk.msra.mxu1 %vm407_vm0, %v392_v5 }
  0x16   : > { %894 = vmatmul.mubr.msk.f32.vlgmr.msra.gmra.mrb[0].mxu0 %vm403_vm1, %v390_v8  ;;  %897 = vmatmul.mubr.msk.f32.vlgmr.msra.gmra.mrb[0].mxu1 %vm403_vm1, %v390_v8 }
  0x17   : > { %656 = vmatprep.mubr.f32.mxu0 %v967_v0  ;;  %727 = vmatprep.mubr.f32.mxu1 %v967_v0 }
  0x88   : > { %v397_v11 = vpop.permute.xlu0 %396 }
  0x8c   : > { %v575_v29 = vpop.permute.xlu0 %574 }
  0xe9   : > { %v482_v12 = vpop.f32.mrb[0].mxu0  ;;  %v553_v13 = vpop.f32.mrb[0].mxu1 }
  0xea   : > { %v483_v16 = vadd.f32 %v482_v12, %v397_v11  ;;  %v554_v17 = vadd.f32 %v553_v13, %v397_v11  ;;  %v484_v18 = vpop.f32.mrb[1].mxu0  ;;  %v555_v19 = vpop.f32.mrb[1].mxu1 }
  0xeb   : > { %v485_v20 = vadd.f32 %v484_v18, %v397_v11  ;;  %v556_v21 = vadd.f32 %v555_v19, %v397_v11 }
  0xec   : > { %v566_v24 = vmul.f32 %v558_v9, %v483_v16  ;;  %v568_v25 = vmul.f32 %v559_v10, %v554_v17 }
  0xed   : > { %v567_v22 = vmul.f32 %v562_v14, %v485_v20  ;;  %v569_v23 = vmul.f32 %v563_v15, %v556_v21 }
  0xef   : > { %898 = vmatprep.subr.msk.mxu0 %vm407_vm0, %v567_v22  ;;  %901 = vmatprep.subr.msk.mxu1 %vm407_vm0, %v569_v23 }
  0xf0   : > { %899 = vmatpush1.msk.msra.mxu0 %vm407_vm0, %v566_v24  ;;  %902 = vmatpush1.msk.msra.mxu1 %vm407_vm0, %v568_v25 }
  0xf1   : > { %900 = vmatmul.mubr.msk.f32.vlgmr.msra.gmra.mrb[2].mxu0 %vm403_vm1, %v570_v26  ;;  %903 = vmatmul.mubr.msk.f32.vlgmr.msra.gmra.mrb[2].mxu1 %vm403_vm1, %v570_v26 }
 0x1c4   : > { %v658_v30 = vpop.f32.mrb[2].mxu0  ;;  %v729_v31 = vpop.f32.mrb[2].mxu1 }
 0x1c5   : > { %v659_v34 = vadd.f32 %v658_v30, %v575_v29  ;;  %v730_v35 = vadd.f32 %v729_v31, %v575_v29  ;;  %v660_v36 = vpop.f32.mrb[3].mxu0  ;;  %v731_v37 = vpop.f32.mrb[3].mxu1 }
 0x1c6   : > { %v661_v38 = vadd.f32 %v660_v36, %v575_v29  ;;  %v732_v39 = vadd.f32 %v731_v37, %v575_v29 }
 0x1c7   : > { %v742_v40 = vadd.f32 %v734_v27, %v659_v34  ;;  %v744_v41 = vadd.f32 %v735_v28, %v730_v35 }
 0x1c8   : > { %v743_v42 = vadd.f32 %v738_v32, %v661_v38  ;;  %v745_v43 = vadd.f32 %v739_v33, %v732_v39 }
 0x1ca   : > { %v750_v44 = vcombine.low %v742_v40, %v743_v42  ;;  %v751_v45 = vcombine.low %v744_v41, %v745_v43 }
 0x1cc   : > { %754 = vst [vmem:[%s388_s28] sm:$0xff] %v750_v44  ;;  %755 = vst [vmem:[%s388_s28 + $0x8] sm:$0xff] %v751_v45 }
 0x1cd PF: > { %s17_s26 = sadd.s32 1, %s965_s26   ;;  %s1086_s24 = smov %s961_s25 }
 0x1ce   : > { %p14_p5 = scmp.ge.s32.totalorder %s17_s26, 4   ;;  %s1087_s25 = smov %s1089_s27 }
 0x1d0   :  { %16 = sbr.rel (!%p14_p5) target bundleno = 2 (0x2), region = 84 }

// kernel: spatial_attention_forward.4
= control target key start
LH: loop header
LB: loop body
LE: loop exit
PB: predicated region body
PF: predicated region fallthrough
CT: control target
= control target key end

     0   :  { %10 = vsyncpa [#allocation5], 0  ;;  %s3175_s0 = inlined_call_operand.vmem [shape: f32[2,4,8,64], index: 0, kind: input, shape index: {}]   ;;  %s3176_s1 = inlined_call_operand.vmem [shape: f32[4], index: 1, kind: input, shape index: {}]   ;;  %s3177_s2 = inlined_call_operand.vmem [shape: f32[4], index: 2, kind: input, shape index: {}]   ;;  %s3178_s3 = inlined_call_operand.vmem [shape: f32[4,5,64,64], index: 3, kind: input, shape index: {}]   ;;  %s3179_s4 = inlined_call_operand.vmem [shape: f32[4,11,64,64], index: 4, kind: input, shape index: {}]   ;;  %s3180_s5 = inlined_call_operand.vmem [shape: f32[2,4,8,64], index: 5, kind: output, shape index: {}]  }
   0x1   :  { %11 = vsyncpa [#allocation7], 0  ;;  %s2806_s18 = smov 0   ;;  %s2808_s19 = smov 0  }
   0x2   :  { %s2810_s20 = smov 0   ;;  %s2812_s21 = smov 0  }
   0x3   :  { %s2814_s22 = smov 0  }
   0x4 LB: > { %s1813_s23 = sadd.s32 4294967295, %s2769_s22   ;;  %s26_s24 = sadd.s32 1, %s2761_s20  ;;  %s2769_s22 = sphi %s2814_s22, %s17_s22   ;;  %s2765_s21 = sphi %s2812_s21, %s3192_s21   ;;  %s2761_s20 = sphi %s2810_s20, %s3191_s20   ;;  %s2757_s19 = sphi %s2808_s19, %s3190_s19   ;;  %s2753_s18 = sphi %s2806_s18, %s3189_s18  }
   0x5   : > { %p27_p0 = scmp.ge.s32.totalorder %s26_s24, 2  ;;  %s29_s25 = sadd.s32 1, %s2765_s21 }
   0x6   : > { %p1815_p1 = scmp.ge.s32.totalorder %s2769_s22, 1  ;;  %p184_p2 = scmp.lt.s32.totalorder %s2769_s22, 9 }
   0x7   : > { %s3194_s24 = smov (%p27_p0, %s26_s24), 0  ;;  %s3196_s25 = smov (!%p27_p0, %s29_s25), %s2765_s21 }
   0x8   : > { %p2839_p3 = pnand %p1815_p1, %p184_p2  ;;  %p31_p4 = scmp.ge.s32.totalorder %s3196_s25, 4 }
   0x9   : > { %p2843_p5 = scmp.eq.s32.totalorder %s1813_s23, 0  ;;  %s197_s30 = sshll.u32 %s3176_s1, 4  ;;  %s198_s30 = int_to_ptr.vmem [resolvable:$true] %s197_s30 }
   0xa   : > { %s3184_s26 = scalar_select %p2839_p3, 1, 0 }
   0xb   : > { %s3185_s27 = scalar_select %p2843_p5, 1, 0 }
   0xc   : > { %p2637_p6 = pneg %p2839_p3  ;;  %s3198_s25 = smov (%p31_p4, %s3196_s25), 0 }
   0xd   : > { %s208_s9 = sshll.u32 %s3177_s2, 4  ;;  %s2693_s10 = scalar_lea.vmem %s198_s30, 16  ;;  %s209_s9 = int_to_ptr.vmem [resolvable:$true] %s208_s9 }
   0xe   : > { %p2856_p7 = pnand %p2843_p5, %p2637_p6  ;;  %p2694_p8 = scmp.ne.s32.totalorder %s198_s30, %s2693_s10 }
   0xf   : > { %p2701_p12 = scmp.lt.s32.totalorder %s198_s30, %s198_s30  ;;  %p2702_p13 = scmp.lt.s32.totalorder %s2693_s10, %s2693_s10 }
  0x10   : > { %p2695_p9 = pneg %p2856_p7 }
  0x11   : > { %p2703_p0 = por %p2702_p13, %p2701_p12 }
  0x12   : > { %p2696_p10 = pnand %p2695_p9, %p2694_p8 }
  0x14   : > { %p2697_p11 = pneg %p2696_p10 }
  0x16   : > { %p2704_p1 = pnand %p2703_p0, %p2697_p11 }
  0x18   : > { %2707 = shalt.err (!%p2704_p1)
}
  0x19   : > { %s2771_s11 = smov [#allocation4]   ;;  %s2708_s12 = scalar_lea.vmem %s209_s9, 16 }
  0x1a   : > { %2640 = dma.vmem_to_smem (!%p2856_p7), %s198_s30, 16, %s2771_s11, [#allocation5]  }
  0x1b   : > { %p2709_p2 = scmp.ne.s32.totalorder %s209_s9, %s2708_s12  ;;  %p2716_p5 = scmp.lt.s32.totalorder %s209_s9, %s209_s9 }
  0x1c   : > { %p2717_p3 = scmp.lt.s32.totalorder %s2708_s12, %s2708_s12 }
  0x1d   : > { %p2711_p4 = pnand %p2709_p2, %p2695_p9 }
  0x1e   : > { %p2718_p8 = por %p2717_p3, %p2716_p5 }
  0x1f   : > { %p2712_p6 = pneg %p2711_p4 }
  0x21   : > { %p2719_p10 = pnand %p2718_p8, %p2712_p6 }
  0x23   : > { %2722 = shalt.err (!%p2719_p10)
}
  0x24   : > { %s2772_s13 = smov [#allocation6]   ;;  %p3187_p11 = scmp.ne.s32.totalorder %s3184_s26, 0 }
  0x25   : > { %2643 = dma.vmem_to_smem (!%p2856_p7), %s209_s9, 16, %s2772_s13, [#allocation7]  }
  0x26   : > { %248 = sbr.rel (%p3187_p11) target bundleno = 689 (0x2b1), region = 40  ;;  %p3188_p12 = scmp.ne.s32.totalorder (!%p3187_p11), %s3185_s27, 0 }
  0x2d   : > { %2744 = dma.done.wait (%p3188_p12), [#allocation5], 16  }
  0x2e   : > { %2746 = vsyncadd (%p3188_p12), [#allocation5], 4294967280 }
  0x2f   : > { %2748 = dma.done.wait (%p3188_p12), [#allocation7], 16  }
  0x30   : > { %2750 = vsyncadd (%p3188_p12), [#allocation7], 4294967280 }
  0x31   : > { %258 = sfence }
  0x32   : > { %p299_p3 = scmp.lt.s32.totalorder %s2757_s19, 3  ;;  %p297_p5 = scmp.lt.s32.totalorder %s2753_s18, 1  ;;  %vm324_vm0 = vcmask 517120   ;;  %v2773_v0 = vmov 0.0|0.0   ;;  %vm2774_vm1 = vmmov 0   ;;  %v2775_v1 = vmov 0.0  }
  0x33   : > { %2406 = vmatprep.subr.bf16.mxu0 %v2773_v0  ;;  %2118 = vmatprep.mubr.msk.f32.mxu0 %vm2774_vm1, %v2775_v1  ;;  %325 = vst.msk [vmem:[#allocation2] sm:$0x3] %vm324_vm0, %v2775_v1  ;;  %326 = vst.msk [vmem:[#allocation2 + $0xa] sm:$0x3] %vm324_vm0, %v2775_v1  ;;  %vm327_vm2 = vcmask 523264   ;;  %vm750_vm3 = vcmask 520192  }
  0x34   : > { %s2887_s14 = scalar_select %p299_p3, %s2757_s19, 3  ;;  %2502 = vmatprep.subr.bf16.mxu1 %v2773_v0  ;;  %2270 = vmatprep.mubr.msk.f32.mxu1 %vm2774_vm1, %v2775_v1  ;;  %751 = vst.msk [vmem:[#allocation3] sm:$0x1f] %vm750_vm3, %v2775_v1  ;;  %752 = vst.msk [vmem:[#allocation3 + $0xd] sm:$0x1f] %vm750_vm3, %v2775_v1 }
  0x35   : > { %s3200_s18 = smov (!%p297_p5, %s2753_s18), 1  ;;  %s329_s10 = sld [smem:[#allocation4 + %s2757_s19]] }
  0x36   : > { %s2627_s15 = smul.u32 320, %s2887_s14  ;;  %s1822_s16 = sshll.u32 %s3200_s18, 2 }
  0x37   : > { %s2900_s27 = sadd.s32 %s1822_s16, %s2887_s14  ;;  %s2628_s6 = smul.u32 704, %s2887_s14 }
  0x38   : > { %s2897_s26 = scalar_lea.vmem %s3178_s3, %s2627_s15  ;;  %s1823_s18 = sshll.u32 %s2900_s27, 3 }
  0x39   : > { %v332_v2 = vld [vmem:[%s2897_s26] sm:$0xff]  ;;  %v333_v3 = vld [vmem:[%s2897_s26 + $0x8] sm:$0xff]  ;;  %v334_v4 = vld [vmem:[%s2897_s26 + $0x10] sm:$0xff]  ;;  %s304_s30 = scalar_lea.vmem %s3175_s0, %s1823_s18  ;;  %s2926_s9 = scalar_lea.vmem %s3179_s4, %s2628_s6 }
  0x3a   : > { %v2407_v5 = vpack.c.bf16 %v333_v3, %v332_v2  ;;  %v335_v6 = vld [vmem:[%s2897_s26 + $0x18] sm:$0xff]  ;;  %v323_v7 = vld [vmem:[%s304_s30] sm:$0xff]  ;;  %v337_v10 = vld [vmem:[%s2897_s26 + $0x28] sm:$0xff]  ;;  %s754_s11 = sld [smem:[#allocation6 + %s2757_s19]]  ;;  %s322_s14 = scalar_lea.vmem %s3180_s5, %s1823_s18 }
  0x3b   : > { %v2410_v8 = vpack.c.bf16 %v335_v6, %v334_v4  ;;  %328 = vst.msk [vmem:[#allocation2 + $0x2] sm:$0xff] %vm327_vm2, %v323_v7  ;;  %v336_v9 = vld [vmem:[%s2897_s26 + $0x20] sm:$0xff]  ;;  %v338_v12 = vld [vmem:[%s2897_s26 + $0x30] sm:$0xff]  ;;  %v339_v13 = vld [vmem:[%s2897_s26 + $0x38] sm:$0xff] }
  0x3c   : > { %2408 = vmatpush3.bf16.msra.mxu0 %v2407_v5  ;;  %v2413_v11 = vpack.c.bf16 %v337_v10, %v336_v9  ;;  %v2416_v14 = vpack.c.bf16 %v339_v13, %v338_v12  ;;  %v1829_v15 = vld [vmem:[%s2897_s26 + $0x40] sm:$0xff]  ;;  %v1830_v16 = vld [vmem:[%s2897_s26 + $0x48] sm:$0xff]  ;;  %v1831_v19 = vld [vmem:[%s2897_s26 + $0x50] sm:$0xff] }
  0x3d   : > { %2409 = vmatprep.subr.bf16.mxu0 %v2773_v0  ;;  %v2419_v18 = vpack.c.bf16 %v1830_v16, %v1829_v15  ;;  %v1832_v20 = vld [vmem:[%s2897_s26 + $0x58] sm:$0xff]  ;;  %v1884_v21 = vld [vmem:[%s2926_s9 + $0xc0] sm:$0xff]  ;;  %v1885_v22 = vld [vmem:[%s2926_s9 + $0xc8] sm:$0xff] }
  0x3e   : > { %v2503_v23 = vpack.c.bf16 %v1885_v22, %v1884_v21  ;;  %v1886_v24 = vld [vmem:[%s2926_s9 + $0xd0] sm:$0xff]  ;;  %v1887_v25 = vld [vmem:[%s2926_s9 + $0xd8] sm:$0xff]  ;;  %v2422_v26 = vpack.c.bf16 %v1832_v20, %v1831_v19  ;;  %v1833_v27 = vld [vmem:[%s2897_s26 + $0x60] sm:$0xff] }
  0x3f   : > { %v1834_v28 = vld [vmem:[%s2897_s26 + $0x68] sm:$0xff]  ;;  %v2506_v29 = vpack.c.bf16 %v1887_v25, %v1886_v24  ;;  %v1835_v31 = vld [vmem:[%s2897_s26 + $0x70] sm:$0xff]  ;;  %v1836_v32 = vld [vmem:[%s2897_s26 + $0x78] sm:$0xff] }
  0x40   : > { %2411 = vmatpush3.bf16.msra.mxu0 %v2410_v8  ;;  %2504 = vmatpush3.bf16.msra.mxu1 %v2503_v23  ;;  %v2425_v30 = vpack.c.bf16 %v1834_v28, %v1833_v27  ;;  %v2428_v33 = vpack.c.bf16 %v1836_v32, %v1835_v31  ;;  %v1838_v34 = vld [vmem:[%s2897_s26 + $0x80] sm:$0xff]  ;;  %v1839_v35 = vld [vmem:[%s2897_s26 + $0x88] sm:$0xff]  ;;  %v1840_v38 = vld [vmem:[%s2897_s26 + $0x90] sm:$0xff] }
  0x41   : > { %2412 = vmatprep.subr.bf16.mxu0 %v2773_v0  ;;  %2505 = vmatprep.subr.bf16.mxu1 %v2773_v0  ;;  %v2431_v37 = vpack.c.bf16 %v1839_v35, %v1838_v34  ;;  %v1841_v39 = vld [vmem:[%s2897_s26 + $0x98] sm:$0xff]  ;;  %v1842_v41 = vld [vmem:[%s2897_s26 + $0xa0] sm:$0xff]  ;;  %v1843_v42 = vld [vmem:[%s2897_s26 + $0xa8] sm:$0xff] }
  0x42   : > { %v331_v17 = vld [vmem:[#allocation2] sm:$0xff]  ;;  %v2434_v40 = vpack.c.bf16 %v1841_v39, %v1840_v38  ;;  %v2437_v43 = vpack.c.bf16 %v1843_v42, %v1842_v41  ;;  %v1844_v44 = vld [vmem:[%s2897_s26 + $0xb0] sm:$0xff]  ;;  %v1845_v45 = vld [vmem:[%s2897_s26 + $0xb8] sm:$0xff] }
  0x43   : > { %v414_v36 = vld [vmem:[#allocation2 + $0x1] sm:$0xff]  ;;  %v2440_v46 = vpack.c.bf16 %v1845_v45, %v1844_v44  ;;  %v1849_v51 = vld [vmem:[%s2897_s26 + $0xd0] sm:$0xff]  ;;  %v1850_v52 = vld [vmem:[%s2897_s26 + $0xd8] sm:$0xff] }
  0x44   : > { %2414 = vmatpush3.bf16.msra.mxu0 %v2413_v11  ;;  %2507 = vmatpush3.bf16.msra.mxu1 %v2506_v29  ;;  %v1847_v47 = vld [vmem:[%s2897_s26 + $0xc0] sm:$0xff]  ;;  %v1848_v48 = vld [vmem:[%s2897_s26 + $0xc8] sm:$0xff]  ;;  %v2446_v53 = vpack.c.bf16 %v1850_v52, %v1849_v51  ;;  %v1853_v57 = vld [vmem:[%s2897_s26 + $0xf0] sm:$0xff] }
  0x45   : > { %2415 = vmatprep.subr.bf16.mxu0 %v2773_v0  ;;  %2508 = vmatprep.subr.bf16.mxu1 %v2773_v0  ;;  %v498_v49 = vld [vmem:[#allocation2 + $0x2] sm:$0xff]  ;;  %v2443_v50 = vpack.c.bf16 %v1848_v48, %v1847_v47  ;;  %v1854_v58 = vld [vmem:[%s2897_s26 + $0xf8] sm:$0xff]  ;;  %v1858_v2 = vld [vmem:[%s2897_s26 + $0x110] sm:$0xff] }
  0x46   : > { %v1851_v54 = vld [vmem:[%s2897_s26 + $0xe0] sm:$0xff]  ;;  %v1852_v55 = vld [vmem:[%s2897_s26 + $0xe8] sm:$0xff]  ;;  %v2452_v59 = vpack.c.bf16 %v1854_v58, %v1853_v57  ;;  %v1859_v3 = vld [vmem:[%s2897_s26 + $0x118] sm:$0xff] }
  0x47   : > { %v2449_v56 = vpack.c.bf16 %v1852_v55, %v1851_v54  ;;  %v1856_v60 = vld [vmem:[%s2897_s26 + $0x100] sm:$0xff]  ;;  %v1857_v61 = vld [vmem:[%s2897_s26 + $0x108] sm:$0xff]  ;;  %v2458_v4 = vpack.c.bf16 %v1859_v3, %v1858_v2  ;;  %v1862_v8 = vld [vmem:[%s2897_s26 + $0x130] sm:$0xff] }
  0x48   : > { %2417 = vmatpush3.bf16.msra.mxu0 %v2416_v14  ;;  %v582_v62 = vld [vmem:[#allocation2 + $0x3] sm:$0xff]  ;;  %v2455_v63 = vpack.c.bf16 %v1857_v61, %v1856_v60  ;;  %v1863_v9 = vld [vmem:[%s2897_s26 + $0x138] sm:$0xff]  ;;  %v759_v15 = vld [vmem:[%s2926_s9 + $0x10] sm:$0xff] }
  0x49   : > { %2418 = vmatprep.subr.bf16.mxu0 %v2773_v0  ;;  %v1860_v5 = vld [vmem:[%s2897_s26 + $0x120] sm:$0xff]  ;;  %v1861_v6 = vld [vmem:[%s2897_s26 + $0x128] sm:$0xff]  ;;  %v2464_v10 = vpack.c.bf16 %v1863_v9, %v1862_v8  ;;  %v760_v16 = vld [vmem:[%s2926_s9 + $0x18] sm:$0xff] }
  0x4a   : > { %v2461_v7 = vpack.c.bf16 %v1861_v6, %v1860_v5  ;;  %v757_v11 = vld [vmem:[%s2926_s9] sm:$0xff]  ;;  %v758_v12 = vld [vmem:[%s2926_s9 + $0x8] sm:$0xff]  ;;  %v763_v24 = vld [vmem:[%s2926_s9 + $0x30] sm:$0xff] }
  0x4b   : > { %2119 = vmatmul.mubr.msk.f32.vlgmr.msra.gmra.mrb[0].mxu0 %vm327_vm2, %v331_v17  ;;  %v666_v13 = vld [vmem:[#allocation2 + $0x4] sm:$0xff]  ;;  %v2467_v14 = vpack.c.bf16 %v758_v12, %v757_v11  ;;  %v2470_v17 = vpack.c.bf16 %v760_v16, %v759_v15  ;;  %v764_v25 = vld [vmem:[%s2926_s9 + $0x38] sm:$0xff]  ;;  %v1895_v42 = vld [vmem:[%s2926_s9 + $0x110] sm:$0xff] }
  0x4c   : > { %2420 = vmatpush3.bf16.msra.mxu0 %v2419_v18  ;;  %2137 = vmatprep.mubr.msk.f32.mxu0 %vm2774_vm1, %v2775_v1  ;;  %v761_v18 = vld [vmem:[%s2926_s9 + $0x20] sm:$0xff]  ;;  %v762_v19 = vld [vmem:[%s2926_s9 + $0x28] sm:$0xff]  ;;  %v2476_v27 = vpack.c.bf16 %v764_v25, %v763_v24  ;;  %v1891_v28 = vld [vmem:[%s2926_s9 + $0xf8] sm:$0xff] }
  0x4d   : > { %2421 = vmatprep.subr.bf16.mxu0 %v2773_v0  ;;  %v1888_v20 = vld [vmem:[%s2926_s9 + $0xe0] sm:$0xff]  ;;  %v2473_v21 = vpack.c.bf16 %v762_v19, %v761_v18  ;;  %v1889_v22 = vld [vmem:[%s2926_s9 + $0xe8] sm:$0xff]  ;;  %v1869_v41 = vld [vmem:[%s2926_s9 + $0x58] sm:$0xff] }
  0x4e   : > { %v2509_v23 = vpack.c.bf16 %v1889_v22, %v1888_v20  ;;  %v1866_v34 = vld [vmem:[%s2926_s9 + $0x40] sm:$0xff]  ;;  %v1867_v35 = vld [vmem:[%s2926_s9 + $0x48] sm:$0xff]  ;;  %v1872_v54 = vld [vmem:[%s2926_s9 + $0x70] sm:$0xff] }
  0x4f   : > { %v2479_v38 = vpack.c.bf16 %v1867_v35, %v1866_v34  ;;  %v1870_v48 = vld [vmem:[%s2926_s9 + $0x60] sm:$0xff]  ;;  %v1898_v51 = vld [vmem:[%s2926_s9 + $0x128] sm:$0xff]  ;;  %v1873_v55 = vld [vmem:[%s2926_s9 + $0x78] sm:$0xff] }
  0x50   : > { %2423 = vmatpush3.bf16.msra.mxu0 %v2422_v26  ;;  %v1890_v26 = vld [vmem:[%s2926_s9 + $0xf0] sm:$0xff]  ;;  %2510 = vmatpush3.bf16.msra.mxu1 %v2509_v23  ;;  %v1900_v57 = vld [vmem:[%s2926_s9 + $0x138] sm:$0xff]  ;;  %v2488_v58 = vpack.c.bf16 %v1873_v55, %v1872_v54  ;;  %v1875_v60 = vld [vmem:[%s2926_s9 + $0x80] sm:$0xff] }
  0x51   : > { %2424 = vmatprep.subr.bf16.mxu0 %v2773_v0  ;;  %2511 = vmatprep.subr.bf16.mxu1 %v2773_v0  ;;  %v2512_v29 = vpack.c.bf16 %v1891_v28, %v1890_v26  ;;  %v1876_v61 = vld [vmem:[%s2926_s9 + $0x88] sm:$0xff]  ;;  %v1878_v5 = vld [vmem:[%s2926_s9 + $0x98] sm:$0xff]  ;;  %v1904_v6 = vld [vmem:[%s2926_s9 + $0x150] sm:$0xff] }
  0x52   : > { %v2491_v2 = vpack.c.bf16 %v1876_v61, %v1875_v60  ;;  %v1879_v12 = vld [vmem:[%s2926_s9 + $0xa0] sm:$0xff]  ;;  %v1907_v15 = vld [vmem:[%s2926_s9 + $0x168] sm:$0xff]  ;;  %v1881_v18 = vld [vmem:[%s2926_s9 + $0xb0] sm:$0xff] }
  0x53   : > { %v1882_v19 = vld [vmem:[%s2926_s9 + $0xb8] sm:$0xff]  ;;  %v1908_v20 = vld [vmem:[%s2926_s9 + $0x170] sm:$0xff]  ;;  %v1911_v24 = vld [vmem:[%s2926_s9 + $0x180] sm:$0xff] }
  0x54   : > { %2426 = vmatpush3.bf16.msra.mxu0 %v2425_v30  ;;  %2513 = vmatpush3.bf16.msra.mxu1 %v2512_v29  ;;  %v330_v30 = vstv %s329_s10  ;;  %v2500_v22 = vpack.c.bf16 %v1882_v19, %v1881_v18  ;;  %v1912_v25 = vld [vmem:[%s2926_s9 + $0x188] sm:$0xff]  ;;  %v1914_v28 = vld [vmem:[%s2926_s9 + $0x198] sm:$0xff]  ;;  %v1917_v35 = vld [vmem:[%s2926_s9 + $0x1b0] sm:$0xff] }
  0x55   : > { %2427 = vmatprep.subr.bf16.mxu0 %v2773_v0  ;;  %2514 = vmatprep.subr.bf16.mxu1 %v2773_v0  ;;  %v2539_v26 = vpack.c.bf16 %v1912_v25, %v1911_v24  ;;  %v1931_v54 = vld [vmem:[%s2926_s9 + $0x210] sm:$0xff]  ;;  %v1932_v55 = vld [vmem:[%s2926_s9 + $0x218] sm:$0xff] }
  0x56   : > { %v1935_v61 = vld [vmem:[%s2926_s9 + $0x230] sm:$0xff]  ;;  %v1950_v19 = vld [vmem:[%s2926_s9 + $0x298] sm:$0xff] }
  0x57   : > { %v1949_v18 = vld [vmem:[%s2926_s9 + $0x290] sm:$0xff] }
  0x58   : > { %2429 = vmatpush3.bf16.msra.mxu0 %v2428_v33  ;;  %v1953_v25 = vld [vmem:[%s2926_s9 + $0x2b0] sm:$0xff] }
  0x59   : > { %2430 = vmatprep.subr.bf16.mxu0 %v2773_v0 }
  0x5b   : > { %2138 = vmatmul.mubr.msk.f32.vlgmr.msra.gmra.mrb[0].mxu0 %vm327_vm2, %v414_v36  ;;  %v1893_v36 = vld [vmem:[%s2926_s9 + $0x100] sm:$0xff] }
  0x5c   : > { %2432 = vmatpush3.bf16.msra.mxu0 %v2431_v37  ;;  %2156 = vmatprep.mubr.msk.f32.mxu0 %vm2774_vm1, %v2775_v1  ;;  %v1894_v37 = vld [vmem:[%s2926_s9 + $0x108] sm:$0xff] }
  0x5d   : > { %2433 = vmatprep.subr.bf16.mxu0 %v2773_v0  ;;  %v2515_v39 = vpack.c.bf16 %v1894_v37, %v1893_v36  ;;  %v1918_v36 = vld [vmem:[%s2926_s9 + $0x1b8] sm:$0xff] }
  0x5e   : > { %v2548_v37 = vpack.c.bf16 %v1918_v36, %v1917_v35 }
  0x60   : > { %2435 = vmatpush3.bf16.msra.mxu0 %v2434_v40  ;;  %v1868_v40 = vld [vmem:[%s2926_s9 + $0x50] sm:$0xff] }
  0x61   : > { %2436 = vmatprep.subr.bf16.mxu0 %v2773_v0 }
  0x64   : > { %2438 = vmatpush3.bf16.msra.mxu0 %v2437_v43  ;;  %v1896_v43 = vld [vmem:[%s2926_s9 + $0x118] sm:$0xff] }
  0x65   : > { %2439 = vmatprep.subr.bf16.mxu0 %v2773_v0  ;;  %v2518_v47 = vpack.c.bf16 %v1896_v43, %v1895_v42  ;;  %v1923_v42 = vld [vmem:[%s2926_s9 + $0x1d8] sm:$0xff] }
  0x68   : > { %2441 = vmatpush3.bf16.msra.mxu0 %v2440_v46  ;;  %v2482_v46 = vpack.c.bf16 %v1869_v41, %v1868_v40  ;;  %v1922_v41 = vld [vmem:[%s2926_s9 + $0x1d0] sm:$0xff] }
  0x69   : > { %2442 = vmatprep.subr.bf16.mxu0 %v2773_v0 }
  0x6b   : > { %2157 = vmatmul.mubr.msk.f32.vlgmr.msra.gmra.mrb[0].mxu0 %vm327_vm2, %v498_v49  ;;  %v1871_v49 = vld [vmem:[%s2926_s9 + $0x68] sm:$0xff] }
  0x6c   : > { %2444 = vmatpush3.bf16.msra.mxu0 %v2443_v50  ;;  %2175 = vmatprep.mubr.msk.f32.mxu0 %vm2774_vm1, %v2775_v1  ;;  %v1897_v50 = vld [vmem:[%s2926_s9 + $0x120] sm:$0xff]  ;;  %v2485_v52 = vpack.c.bf16 %v1871_v49, %v1870_v48  ;;  %v1926_v48 = vld [vmem:[%s2926_s9 + $0x1f0] sm:$0xff]  ;;  %v1927_v49 = vld [vmem:[%s2926_s9 + $0x1f8] sm:$0xff] }
  0x6d   : > { %2445 = vmatprep.subr.bf16.mxu0 %v2773_v0 }
  0x70   : > { %2447 = vmatpush3.bf16.msra.mxu0 %v2446_v53  ;;  %v2521_v53 = vpack.c.bf16 %v1898_v51, %v1897_v50  ;;  %v2560_v50 = vpack.c.bf16 %v1927_v49, %v1926_v48  ;;  %v1929_v51 = vld [vmem:[%s2926_s9 + $0x200] sm:$0xff] }
  0x71   : > { %2448 = vmatprep.subr.bf16.mxu0 %v2773_v0 }
  0x74   : > { %2450 = vmatpush3.bf16.msra.mxu0 %v2449_v56  ;;  %v1899_v56 = vld [vmem:[%s2926_s9 + $0x130] sm:$0xff] }
  0x75   : > { %2451 = vmatprep.subr.bf16.mxu0 %v2773_v0 }
  0x78   : > { %2453 = vmatpush3.bf16.msra.mxu0 %v2452_v59  ;;  %v2524_v59 = vpack.c.bf16 %v1900_v57, %v1899_v56  ;;  %v2566_v57 = vpack.c.bf16 %v1932_v55, %v1931_v54 }
  0x79   : > { %2454 = vmatprep.subr.bf16.mxu0 %v2773_v0 }
  0x7b   : > { %2176 = vmatmul.mubr.msk.f32.vlgmr.msra.gmra.mrb[0].mxu0 %vm327_vm2, %v582_v62  ;;  %v1902_v62 = vld [vmem:[%s2926_s9 + $0x140] sm:$0xff] }
  0x7c   : > { %2456 = vmatpush3.bf16.msra.mxu0 %v2455_v63  ;;  %2194 = vmatprep.mubr.msk.f32.mxu0 %vm2774_vm1, %v2775_v1  ;;  %v1903_v63 = vld [vmem:[%s2926_s9 + $0x148] sm:$0xff] }
  0x7d   : > { %2457 = vmatprep.subr.bf16.mxu0 %v2773_v0  ;;  %v2527_v3 = vpack.c.bf16 %v1903_v63, %v1902_v62  ;;  %v1936_v62 = vld [vmem:[%s2926_s9 + $0x238] sm:$0xff] }
  0x7e   : > { %v2572_v63 = vpack.c.bf16 %v1936_v62, %v1935_v61 }
  0x80   : > { %2459 = vmatpush3.bf16.msra.mxu0 %v2458_v4  ;;  %v1877_v4 = vld [vmem:[%s2926_s9 + $0x90] sm:$0xff] }
  0x81   : > { %2460 = vmatprep.subr.bf16.mxu0 %v2773_v0 }
  0x84   : > { %2462 = vmatpush3.bf16.msra.mxu0 %v2461_v7  ;;  %v1905_v7 = vld [vmem:[%s2926_s9 + $0x158] sm:$0xff] }
  0x85   : > { %2463 = vmatprep.subr.bf16.mxu0 %v2773_v0  ;;  %v2530_v11 = vpack.c.bf16 %v1905_v7, %v1904_v6  ;;  %v1941_v6 = vld [vmem:[%s2926_s9 + $0x258] sm:$0xff] }
  0x88   : > { %2465 = vmatpush3.bf16.msra.mxu0 %v2464_v10  ;;  %v2494_v10 = vpack.c.bf16 %v1878_v5, %v1877_v4  ;;  %v1940_v5 = vld [vmem:[%s2926_s9 + $0x250] sm:$0xff] }
  0x89   : > { %2466 = vmatprep.subr.bf16.mxu0 %v2773_v0 }
  0x8b   : > { %2195 = vmatmul.mubr.msk.f32.vlgmr.msra.gmra.mrb[0].mxu0 %vm327_vm2, %v666_v13  ;;  %v1880_v13 = vld [vmem:[%s2926_s9 + $0xa8] sm:$0xff] }
  0x8c   : > { %2468 = vmatpush3.bf16.msra.mxu0 %v2467_v14  ;;  %2213 = vmatprep.mubr.msk.f32.mxu0 %vm2774_vm1, %v2775_v1  ;;  %v1906_v14 = vld [vmem:[%s2926_s9 + $0x160] sm:$0xff]  ;;  %v2497_v16 = vpack.c.bf16 %v1880_v13, %v1879_v12  ;;  %v1944_v12 = vld [vmem:[%s2926_s9 + $0x270] sm:$0xff]  ;;  %v1945_v13 = vld [vmem:[%s2926_s9 + $0x278] sm:$0xff] }
  0x8d   : > { %2469 = vmatprep.subr.bf16.mxu0 %v2773_v0 }
  0x90   : > { %2471 = vmatpush3.bf16.msra.mxu0 %v2470_v17  ;;  %v2533_v17 = vpack.c.bf16 %v1907_v15, %v1906_v14  ;;  %v2584_v14 = vpack.c.bf16 %v1945_v13, %v1944_v12  ;;  %v1947_v15 = vld [vmem:[%s2926_s9 + $0x280] sm:$0xff] }
  0x91   : > { %2472 = vmatprep.subr.bf16.mxu0 %v2773_v0 }
  0x94   : > { %2474 = vmatpush3.bf16.msra.mxu0 %v2473_v21  ;;  %v1909_v21 = vld [vmem:[%s2926_s9 + $0x178] sm:$0xff] }
  0x95   : > { %2475 = vmatprep.subr.bf16.mxu0 %v2773_v0  ;;  %v2536_v23 = vpack.c.bf16 %v1909_v21, %v1908_v20  ;;  %v2590_v21 = vpack.c.bf16 %v1950_v19, %v1949_v18 }
  0x98   : > { %2477 = vmatpush3.bf16.msra.mxu0 %v2476_v27  ;;  %v1913_v27 = vld [vmem:[%s2926_s9 + $0x190] sm:$0xff] }
  0x99   : > { %2478 = vmatprep.subr.bf16.mxu0 %v2773_v0 }
 0x15e   : > { %v745_v31 = vpop.f32.mrb[0].mxu0 }
 0x15f   : > { %v2598_v32 = vadd.f32 %v745_v31, %v330_v30  ;;  %v2196_v33 = vpop.f32.mrb[1].mxu0  ;;  %v2542_v31 = vpack.c.bf16 %v1914_v28, %v1913_v27 }
 0x160   : > { %v1916_v33 = vld [vmem:[%s2926_s9 + $0x1a8] sm:$0xff] }
 0x161   : > { %753 = vst.msk [vmem:[#allocation3 + $0x5] sm:$0xff] %vm327_vm2, %v2598_v32  ;;  %v1915_v32 = vld [vmem:[%s2926_s9 + $0x1a0] sm:$0xff] }
 0x162   : > { %v2545_v34 = vpack.c.bf16 %v1916_v33, %v1915_v32 }
 0x168   : > { %v756_v44 = vld [vmem:[#allocation3] sm:$0xff]  ;;  %v1427_v7 = vld [vmem:[#allocation3 + $0x8] sm:$0xff] }
 0x169   : > { %v1007_v45 = vld [vmem:[#allocation3 + $0x3] sm:$0xff]  ;;  %2214 = vmatmul.mubr.msk.f32.vlgmr.msra.gmra.mrb[2].mxu0 %vm327_vm2, %v756_v44  ;;  %v2554_v44 = vpack.c.bf16 %v1923_v42, %v1922_v41 }
 0x16a   : > { %2271 = vmatmul.mubr.msk.f32.vlgmr.msra.gmra.mrb[0].mxu1 %vm327_vm2, %v1007_v45  ;;  %2480 = vmatpush3.bf16.msra.mxu0 %v2479_v38  ;;  %v839_v8 = vld [vmem:[#allocation3 + $0x1] sm:$0xff]  ;;  %v1920_v38 = vld [vmem:[%s2926_s9 + $0x1c0] sm:$0xff] }
 0x16b   : > { %2516 = vmatpush3.bf16.msra.mxu1 %v2515_v39  ;;  %2481 = vmatprep.subr.bf16.mxu0 %v2773_v0  ;;  %v1091_v9 = vld [vmem:[#allocation3 + $0x4] sm:$0xff]  ;;  %v1921_v39 = vld [vmem:[%s2926_s9 + $0x1c8] sm:$0xff]  ;;  %v1924_v45 = vld [vmem:[%s2926_s9 + $0x1e0] sm:$0xff] }
 0x16c   : > { %2517 = vmatprep.subr.bf16.mxu1 %v2773_v0  ;;  %2232 = vmatprep.mubr.msk.f32.mxu0 %vm2774_vm1, %v2775_v1  ;;  %v923_v29 = vld [vmem:[#allocation3 + $0x2] sm:$0xff]  ;;  %v2551_v40 = vpack.c.bf16 %v1921_v39, %v1920_v38  ;;  %v1595_v28 = vld [vmem:[#allocation3 + $0xa] sm:$0xff] }
 0x16d   : > { %2289 = vmatprep.mubr.msk.f32.mxu1 %vm2774_vm1, %v2775_v1  ;;  %v1175_v30 = vld [vmem:[#allocation3 + $0x5] sm:$0xff] }
 0x16e   : > { %2483 = vmatpush3.bf16.msra.mxu0 %v2482_v46  ;;  %v1259_v43 = vld [vmem:[#allocation3 + $0x6] sm:$0xff]  ;;  %v1925_v46 = vld [vmem:[%s2926_s9 + $0x1e8] sm:$0xff] }
 0x16f   : > { %2519 = vmatpush3.bf16.msra.mxu1 %v2518_v47  ;;  %2484 = vmatprep.subr.bf16.mxu0 %v2773_v0  ;;  %v2557_v47 = vpack.c.bf16 %v1925_v46, %v1924_v45  ;;  %v1343_v56 = vld [vmem:[#allocation3 + $0x7] sm:$0xff] }
 0x170   : > { %2520 = vmatprep.subr.bf16.mxu1 %v2773_v0  ;;  %v1511_v20 = vld [vmem:[#allocation3 + $0x9] sm:$0xff] }
 0x172   : > { %2486 = vmatpush3.bf16.msra.mxu0 %v2485_v52  ;;  %v1930_v52 = vld [vmem:[%s2926_s9 + $0x208] sm:$0xff] }
 0x173   : > { %2522 = vmatpush3.bf16.msra.mxu1 %v2521_v53  ;;  %2487 = vmatprep.subr.bf16.mxu0 %v2773_v0  ;;  %v2563_v53 = vpack.c.bf16 %v1930_v52, %v1929_v51 }
 0x174   : > { %2523 = vmatprep.subr.bf16.mxu1 %v2773_v0 }
 0x176   : > { %2489 = vmatpush3.bf16.msra.mxu0 %v2488_v58  ;;  %v1933_v58 = vld [vmem:[%s2926_s9 + $0x220] sm:$0xff] }
 0x177   : > { %2525 = vmatpush3.bf16.msra.mxu1 %v2524_v59  ;;  %2490 = vmatprep.subr.bf16.mxu0 %v2773_v0  ;;  %v1934_v59 = vld [vmem:[%s2926_s9 + $0x228] sm:$0xff] }
 0x178   : > { %2526 = vmatprep.subr.bf16.mxu1 %v2773_v0  ;;  %v2569_v60 = vpack.c.bf16 %v1934_v59, %v1933_v58 }
 0x179   : > { %2233 = vmatmul.mubr.msk.f32.vlgmr.msra.gmra.mrb[2].mxu0 %vm327_vm2, %v839_v8  ;;  %v2578_v8 = vpack.c.bf16 %v1941_v6, %v1940_v5 }
 0x17a   : > { %2290 = vmatmul.mubr.msk.f32.vlgmr.msra.gmra.mrb[0].mxu1 %vm327_vm2, %v1091_v9  ;;  %2492 = vmatpush3.bf16.msra.mxu0 %v2491_v2  ;;  %v1938_v2 = vld [vmem:[%s2926_s9 + $0x240] sm:$0xff] }
 0x17b   : > { %2528 = vmatpush3.bf16.msra.mxu1 %v2527_v3  ;;  %2493 = vmatprep.subr.bf16.mxu0 %v2773_v0  ;;  %v1939_v3 = vld [vmem:[%s2926_s9 + $0x248] sm:$0xff]  ;;  %v1942_v9 = vld [vmem:[%s2926_s9 + $0x260] sm:$0xff] }
 0x17c   : > { %2529 = vmatprep.subr.bf16.mxu1 %v2773_v0  ;;  %2251 = vmatprep.mubr.msk.f32.mxu0 %vm2774_vm1, %v2775_v1  ;;  %v2575_v4 = vpack.c.bf16 %v1939_v3, %v1938_v2 }
 0x17d   : > { %2308 = vmatprep.mubr.msk.f32.mxu1 %vm2774_vm1, %v2775_v1 }
 0x17e   : > { %2495 = vmatpush3.bf16.msra.mxu0 %v2494_v10  ;;  %v1943_v10 = vld [vmem:[%s2926_s9 + $0x268] sm:$0xff] }
 0x17f   : > { %2531 = vmatpush3.bf16.msra.mxu1 %v2530_v11  ;;  %2496 = vmatprep.subr.bf16.mxu0 %v2773_v0  ;;  %v2581_v11 = vpack.c.bf16 %v1943_v10, %v1942_v9 }
 0x180   : > { %2532 = vmatprep.subr.bf16.mxu1 %v2773_v0 }
 0x182   : > { %2498 = vmatpush3.bf16.msra.mxu0 %v2497_v16  ;;  %v1948_v16 = vld [vmem:[%s2926_s9 + $0x288] sm:$0xff] }
 0x183   : > { %2534 = vmatpush3.bf16.msra.mxu1 %v2533_v17  ;;  %2499 = vmatprep.subr.bf16.mxu0 %v2773_v0  ;;  %v2587_v17 = vpack.c.bf16 %v1948_v16, %v1947_v15 }
 0x184   : > { %2535 = vmatprep.subr.bf16.mxu1 %v2773_v0 }
 0x186   : > { %2501 = vmatpush3.bf16.msra.mxu0 %v2500_v22  ;;  %v1951_v22 = vld [vmem:[%s2926_s9 + $0x2a0] sm:$0xff] }
 0x187   : > { %2537 = vmatpush3.bf16.msra.mxu1 %v2536_v23  ;;  %v1952_v23 = vld [vmem:[%s2926_s9 + $0x2a8] sm:$0xff] }
 0x188   : > { %2538 = vmatprep.subr.bf16.mxu1 %v2773_v0  ;;  %v2593_v24 = vpack.c.bf16 %v1952_v23, %v1951_v22 }
 0x189   : > { %2252 = vmatmul.mubr.msk.f32.vlgmr.msra.gmra.mrb[2].mxu0 %vm327_vm2, %v923_v29 }
 0x18a   : > { %2309 = vmatmul.mubr.msk.f32.vlgmr.msra.gmra.mrb[0].mxu1 %vm327_vm2, %v1175_v30  ;;  %v755_v30 = vstv %s754_s11 }
 0x18b   : > { %2540 = vmatpush3.bf16.msra.mxu1 %v2539_v26  ;;  %2327 = vmatprep.mubr.msk.f32.mxu1 %vm2774_vm1, %v2775_v1  ;;  %v1954_v26 = vld [vmem:[%s2926_s9 + $0x2b8] sm:$0xff] }
 0x18c   : > { %2541 = vmatprep.subr.bf16.mxu1 %v2773_v0  ;;  %v2596_v27 = vpack.c.bf16 %v1954_v26, %v1953_v25 }
 0x18f   : > { %2543 = vmatpush3.bf16.msra.mxu1 %v2542_v31 }
 0x190   : > { %2544 = vmatprep.subr.bf16.mxu1 %v2773_v0 }
 0x193   : > { %2546 = vmatpush3.bf16.msra.mxu1 %v2545_v34 }
 0x194   : > { %2547 = vmatprep.subr.bf16.mxu1 %v2773_v0 }
 0x197   : > { %2549 = vmatpush3.bf16.msra.mxu1 %v2548_v37 }
 0x198   : > { %2550 = vmatprep.subr.bf16.mxu1 %v2773_v0 }
 0x19a   : > { %2328 = vmatmul.mubr.msk.f32.vlgmr.msra.gmra.mrb[0].mxu1 %vm327_vm2, %v1259_v43 }
 0x19b   : > { %2552 = vmatpush3.bf16.msra.mxu1 %v2551_v40  ;;  %2346 = vmatprep.mubr.msk.f32.mxu1 %vm2774_vm1, %v2775_v1 }
 0x19c   : > { %2553 = vmatprep.subr.bf16.mxu1 %v2773_v0 }
 0x19f   : > { %2555 = vmatpush3.bf16.msra.mxu1 %v2554_v44 }
 0x1a0   : > { %2556 = vmatprep.subr.bf16.mxu1 %v2773_v0 }
 0x1a3   : > { %2558 = vmatpush3.bf16.msra.mxu1 %v2557_v47 }
 0x1a4   : > { %2559 = vmatprep.subr.bf16.mxu1 %v2773_v0 }
 0x1a7   : > { %2561 = vmatpush3.bf16.msra.mxu1 %v2560_v50 }
 0x1a8   : > { %2562 = vmatprep.subr.bf16.mxu1 %v2773_v0 }
 0x1aa   : > { %2347 = vmatmul.mubr.msk.f32.vlgmr.msra.gmra.mrb[0].mxu1 %vm327_vm2, %v1343_v56 }
 0x1ab   : > { %2564 = vmatpush3.bf16.msra.mxu1 %v2563_v53  ;;  %2365 = vmatprep.mubr.msk.f32.mxu1 %vm2774_vm1, %v2775_v1 }
 0x1ac   : > { %2565 = vmatprep.subr.bf16.mxu1 %v2773_v0 }
 0x1af   : > { %2567 = vmatpush3.bf16.msra.mxu1 %v2566_v57 }
 0x1b0   : > { %2568 = vmatprep.subr.bf16.mxu1 %v2773_v0 }
 0x1b3   : > { %2570 = vmatpush3.bf16.msra.mxu1 %v2569_v60 }
 0x1b4   : > { %2571 = vmatprep.subr.bf16.mxu1 %v2773_v0 }
 0x1b7   : > { %2573 = vmatpush3.bf16.msra.mxu1 %v2572_v63 }
 0x1b8   : > { %2574 = vmatprep.subr.bf16.mxu1 %v2773_v0 }
 0x1ba   : > { %2366 = vmatmul.mubr.msk.f32.vlgmr.msra.gmra.mrb[0].mxu1 %vm327_vm2, %v1427_v7 }
 0x1bb   : > { %2576 = vmatpush3.bf16.msra.mxu1 %v2575_v4  ;;  %2384 = vmatprep.mubr.msk.f32.mxu1 %vm2774_vm1, %v2775_v1 }
 0x1bc   : > { %2577 = vmatprep.subr.bf16.mxu1 %v2773_v0 }
 0x1bf   : > { %2579 = vmatpush3.bf16.msra.mxu1 %v2578_v8 }
 0x1c0   : > { %2580 = vmatprep.subr.bf16.mxu1 %v2773_v0 }
 0x1c3   : > { %2582 = vmatpush3.bf16.msra.mxu1 %v2581_v11 }
 0x1c4   : > { %2583 = vmatprep.subr.bf16.mxu1 %v2773_v0 }
 0x1c7   : > { %2585 = vmatpush3.bf16.msra.mxu1 %v2584_v14 }
 0x1c8   : > { %2586 = vmatprep.subr.bf16.mxu1 %v2773_v0 }
 0x1ca   : > { %2385 = vmatmul.mubr.msk.f32.vlgmr.msra.gmra.mrb[0].mxu1 %vm327_vm2, %v1511_v20 }
 0x1cb   : > { %2588 = vmatpush3.bf16.msra.mxu1 %v2587_v17  ;;  %2403 = vmatprep.mubr.msk.f32.mxu1 %vm2774_vm1, %v2775_v1 }
 0x1cc   : > { %2589 = vmatprep.subr.bf16.mxu1 %v2773_v0 }
 0x1cf   : > { %2591 = vmatpush3.bf16.msra.mxu1 %v2590_v21 }
 0x1d0   : > { %2592 = vmatprep.subr.bf16.mxu1 %v2773_v0 }
 0x1d3   : > { %2594 = vmatpush3.bf16.msra.mxu1 %v2593_v24 }
 0x1d4   : > { %2595 = vmatprep.subr.bf16.mxu1 %v2773_v0 }
 0x1d7   : > { %2597 = vmatpush3.bf16.msra.mxu1 %v2596_v27 }
 0x1da   : > { %2404 = vmatmul.mubr.msk.f32.vlgmr.msra.gmra.mrb[0].mxu1 %vm327_vm2, %v1595_v28 }
 0x25c   : > { %v1002_v1 = vpop.f32.mrb[2].mxu0 }
 0x25d   : > { %v2253_v29 = vpop.f32.mrb[3].mxu0  ;;  %v2599_v31 = vadd.f32 %v1002_v1, %v755_v30 }
 0x2ad   : > { %v1674_v32 = vpop.f32.mrb[0].mxu1 }
 0x2ae   : > { %v2600_v33 = vadd.f32 %v2599_v31, %v1674_v32  ;;  %v2405_v34 = vpop.f32.mrb[1].mxu1 }
 0x2b0   : > { %1679 = vst.msk [vmem:[%s322_s14] sm:$0xff] %vm327_vm2, %v2600_v33 }
 0x2b1 PF: > { %s17_s22 = sadd.s32 1, %s2769_s22   ;;  %s3189_s18 = smov %s2761_s20 }
 0x2b2   : > { %p14_p7 = scmp.ge.s32.totalorder %s17_s22, 10   ;;  %s3190_s19 = smov %s2765_s21 }
 0x2b3   : > { %s3191_s20 = smov %s3194_s24  ;;  %s3192_s21 = smov %s3198_s25 }
 0x2b4   :  { %16 = sbr.rel (!%p14_p7) target bundleno = 4 (0x4), region = 99 }
 0x2bb   :  { %1707 = vsyncpa [#allocation5], 1 }
 0x2bc   :  { %1709 = vsyncpa [#allocation5 + $0x1], 1 }
 0x2bd   :  { %1710 = vsyncpa [#allocation7], 1 }

</bundles_post_ra>
